<compile_context>
chip_gen: v7x
topology: tpu7x:2x2x1
jax: 0.10.0
libtpu: 0.0.40
codegen_flags: <defaults>
</compile_context>

<pallas_src>
import jax
import jax.numpy as jnp
from jax.experimental import pallas as pl
from jax.experimental.pallas import tpu as pltpu

# Small, self-consistent hyperparameters (module constants scaled down).
B = 2             # batch
L = 8             # max_length (== attention step_dim)
E = 16            # embed_size
H = 32            # hidden_size
C = 3             # num_classes
MAX_FEATURES = 50

G4 = 4 * H        # 128: per-direction gate width (i,f,g,o)
G8 = 8 * H        # 256: both directions


def bilstm_att_kernel(emb_ref,        # (L*B, E)   bf16, time-major flattened
                      wih_ref,        # (E, 8H)    bf16  [fwd i,f,g,o | bwd i,f,g,o]
                      whh_ref,        # (2H, 8H)   bf16  blockdiag(Whh_f, Whh_b)
                      b_ref,          # (1, 8H)    f32   (b_ih + b_hh, per direction)
                      attw_ref,       # (1, 2H)    f32
                      l1w_ref,        # (6H, 6H)   bf16
                      l1b_ref,        # (1, 6H)    f32
                      lauxw_ref,      # (6H, C)    bf16
                      lauxb_ref,      # (1, C)     f32
                      aux_ref,        # (B, C)     f32 out
                      wts_ref):       # (B, L)     f32 out
    # ---- hoisted input projection: one matmul for all steps & directions ----
    x_proj = (jnp.dot(emb_ref[...], wih_ref[...],
                      preferred_element_type=jnp.float32)
              + b_ref[...])                                    # (L*B, 8H) f32

    whh = whh_ref[...]                                         # (2H, 8H) bf16

    h_f = jnp.zeros((B, H), jnp.float32)
    c_f = jnp.zeros((B, H), jnp.float32)
    h_b = jnp.zeros((B, H), jnp.float32)
    c_b = jnp.zeros((B, H), jnp.float32)
    h_f_t = [None] * L    # forward hidden state at time t
    h_b_t = [None] * L    # backward hidden state at time t

    # ---- fused fwd+bwd recurrence, fully unrolled (L is small & static) -----
    for s in range(L):
        tf = s              # forward time index
        tb = L - 1 - s      # backward time index
        gx = jnp.concatenate(
            [x_proj[tf * B:(tf + 1) * B, 0:G4],      # fwd gate inputs @ time tf
             x_proj[tb * B:(tb + 1) * B, G4:G8]],    # bwd gate inputs @ time tb
            axis=-1)                                 # (B, 8H)
        h_cat = jnp.concatenate([h_f, h_b], axis=-1).astype(jnp.bfloat16)
        gates = gx + jnp.dot(h_cat, whh,
                             preferred_element_type=jnp.float32)   # (B, 8H)

        # PyTorch gate order per direction: input, forget, cell(g), output
        i_f = jax.nn.sigmoid(gates[:, 0 * H:1 * H])
        f_f = jax.nn.sigmoid(gates[:, 1 * H:2 * H])
        g_f = jnp.tanh(gates[:, 2 * H:3 * H])
        o_f = jax.nn.sigmoid(gates[:, 3 * H:4 * H])
        i_b = jax.nn.sigmoid(gates[:, 4 * H:5 * H])
        f_b = jax.nn.sigmoid(gates[:, 5 * H:6 * H])
        g_b = jnp.tanh(gates[:, 6 * H:7 * H])
        o_b = jax.nn.sigmoid(gates[:, 7 * H:8 * H])

        c_f = f_f * c_f + i_f * g_f
        h_f = o_f * jnp.tanh(c_f)
        c_b = f_b * c_b + i_b * g_b
        h_b = o_b * jnp.tanh(c_b)

        h_f_t[tf] = h_f
        h_b_t[tb] = h_b

    # ---- assemble bidirectional hidden states in vregs (batch-major) --------
    hl = jnp.stack(
        [jnp.concatenate([h_f_t[t], h_b_t[t]], axis=-1) for t in range(L)],
        axis=1)                                                # (B, L, 2H) f32

    # ---- attention (step_dim = L, mask=None), batch-major -------------------
    eij = jnp.tanh(jnp.sum(hl * attw_ref[...], axis=-1))       # (B, L)
    a = jnp.exp(eij)
    a = a / jnp.sum(a, axis=1, keepdims=True) + 1e-10          # eps AFTER divide (torch)
    att = jnp.sum(hl * a[:, :, None], axis=1)                  # (B, 2H)

    # ---- pooling over time ---------------------------------------------------
    avg_pool = jnp.mean(hl, axis=1)                            # (B, 2H)
    max_pool = jnp.max(hl, axis=1)                             # (B, 2H)

    # ---- head ---------------------------------------------------------------
    h_conc = jnp.concatenate([att, max_pool, avg_pool], axis=1)    # (B, 6H) f32
    h1 = jnp.maximum(
        jnp.dot(h_conc.astype(jnp.bfloat16), l1w_ref[...],
                preferred_element_type=jnp.float32) + l1b_ref[...], 0.0)
    hidden = h_conc + h1
    # TODO(synk): torch also computes self.linear_out(hidden) but never returns
    # it from forward(); that dead compute is skipped here.
    aux_ref[...] = (jnp.dot(hidden.astype(jnp.bfloat16), lauxw_ref[...],
                            preferred_element_type=jnp.float32)
                    + lauxb_ref[...])
    wts_ref[...] = a                                           # (B, L), batch-major


def _prepare_kernel_params(params):
    """Repack per-direction LSTM params into the fused layouts (plain-JAX glue)."""
    zeros = jnp.zeros((H, G4), jnp.float32)
    whh_blk = jnp.concatenate(
        [jnp.concatenate([params['whh_f'], zeros], axis=1),
         jnp.concatenate([zeros, params['whh_b']], axis=1)],
        axis=0)                                                 # (2H, 8H)
    wih_cat = jnp.concatenate([params['wih_f'], params['wih_b']], axis=1)  # (E, 8H)
    b_cat = jnp.concatenate([params['b_f'], params['b_b']], axis=1)        # (1, 8H)
    return (wih_cat.astype(jnp.bfloat16),
            whh_blk.astype(jnp.bfloat16),
            b_cat,
            params['attw'],
            params['l1w'].astype(jnp.bfloat16), params['l1b'],
            params['lauxw'].astype(jnp.bfloat16), params['lauxb'])


def bilstm_with_attention(x_ids, params):
    """x_ids: (B, L) int32 token ids.  Returns (aux_result (B,C), weights (B,L,1))."""
    h_emb = jnp.take(params['embedding'], x_ids, axis=0)            # (B, L, E)
    emb_tm = jnp.transpose(h_emb, (1, 0, 2)).reshape(L * B, E)      # time-major flat
    emb_tm = emb_tm.astype(jnp.bfloat16)

    args = (emb_tm,) + _prepare_kernel_params(params)

    vmem = pltpu.MemorySpace.VMEM
    aux, wts = pl.pallas_call(
        bilstm_att_kernel,
        out_shape=(jax.ShapeDtypeStruct((B, C), jnp.float32),
                   jax.ShapeDtypeStruct((B, L), jnp.float32)),
        in_specs=[pl.BlockSpec(memory_space=vmem) for _ in args],
        out_specs=(pl.BlockSpec(memory_space=vmem),
                   pl.BlockSpec(memory_space=vmem)),
    )(*args)
    return aux, wts[:, :, None]


def init_params(key):
    ks = jax.random.split(key, 12)

    def uniform(k, shape, bound):
        return jax.random.uniform(k, shape, jnp.float32, -bound, bound)

    def xavier(k, shape):
        bound = (6.0 / (shape[0] + shape[1])) ** 0.5
        return uniform(k, shape, bound)

    s_lstm = 1.0 / (H ** 0.5)
    s_lin = 1.0 / ((6 * H) ** 0.5)

    params = {
        'embedding': jax.random.normal(ks[0], (MAX_FEATURES, E), jnp.float32),
        # LSTM weights pre-transposed to (in_dim, 4H); gate order i,f,g,o.
        # b_* is b_ih + b_hh combined, shape (1, 4H).
        'wih_f': uniform(ks[1], (E, 4 * H), s_lstm),
        'whh_f': uniform(ks[2], (H, 4 * H), s_lstm),
        'b_f':   uniform(ks[3], (1, 4 * H), s_lstm),
        'wih_b': uniform(ks[4], (E, 4 * H), s_lstm),
        'whh_b': uniform(ks[5], (H, 4 * H), s_lstm),
        'b_b':   uniform(ks[6], (1, 4 * H), s_lstm),
        # Attention weight (2H, 1) xavier-init, stored as (1, 2H) row vector.
        'attw':  xavier(ks[7], (2 * H, 1)).reshape(1, 2 * H),
        # Linear layers stored as (in, out) (i.e. torch W.T), bias (1, out).
        'l1w':   uniform(ks[8], (6 * H, 6 * H), s_lin),
        'l1b':   uniform(ks[9], (1, 6 * H), s_lin),
        'lauxw': uniform(ks[10], (6 * H, C), s_lin),
        'lauxb': uniform(ks[11], (1, C), s_lin),
    }
    return params


if __name__ == "__main__":
    key = jax.random.PRNGKey(0)
    pkey, xkey = jax.random.split(key)
    params = init_params(pkey)
    x_ids = jax.random.randint(xkey, (B, L), 0, MAX_FEATURES, dtype=jnp.int32)
    # step_len argument of the torch forward() is unused; omitted here.
    aux, weights = bilstm_with_attention(x_ids, params)
    jax.block_until_ready((aux, weights))
    assert aux.shape == (B, C) and weights.shape == (B, L, 1)
    print("KERNEL_OK")
</pallas_src>

<mosaic_0001>
module attributes {stable_mosaic.version = 11 : i64} {
  func.func @bilstm_att_kernel(%arg0: memref<16x16xbf16, #tpu.memory_space<vmem>>, %arg1: memref<16x256xbf16, #tpu.memory_space<vmem>>, %arg2: memref<64x256xbf16, #tpu.memory_space<vmem>>, %arg3: memref<1x256xf32, #tpu.memory_space<vmem>>, %arg4: memref<1x64xf32, #tpu.memory_space<vmem>>, %arg5: memref<192x192xbf16, #tpu.memory_space<vmem>>, %arg6: memref<1x192xf32, #tpu.memory_space<vmem>>, %arg7: memref<192x3xbf16, #tpu.memory_space<vmem>>, %arg8: memref<1x3xf32, #tpu.memory_space<vmem>>, %arg9: memref<2x3xf32, #tpu.memory_space<vmem>>, %arg10: memref<2x8xf32, #tpu.memory_space<vmem>>) attributes {dimension_semantics = [], scalar_prefetch = 0 : i64, scratch_operands = 0 : i64, tpu.core_type = #tpu.core_type<tc>} {
    %c0 = arith.constant 0 : index
    %c0_0 = arith.constant 0 : index
    %0 = vector.load %arg0[%c0, %c0_0] : memref<16x16xbf16, #tpu.memory_space<vmem>>, vector<16x16xbf16>
    %c0_1 = arith.constant 0 : index
    %c0_2 = arith.constant 0 : index
    %1 = vector.load %arg1[%c0_1, %c0_2] : memref<16x256xbf16, #tpu.memory_space<vmem>>, vector<16x256xbf16>
    %cst = arith.constant dense<0.000000e+00> : vector<16x256xf32>
    %2 = tpu.matmul %0, %1, %cst {dimension_numbers = #tpu.dot_dimension_numbers<[1], [0], [0], [1], [0, 0, 1, 1], [], []>} : vector<16x16xbf16>, vector<16x256xbf16>, vector<16x256xf32> -> vector<16x256xf32>
    %c0_3 = arith.constant 0 : index
    %c0_4 = arith.constant 0 : index
    %3 = vector.load %arg3[%c0_3, %c0_4] : memref<1x256xf32, #tpu.memory_space<vmem>>, vector<1x256xf32>
    %4 = vector.broadcast %3 : vector<1x256xf32> to vector<16x256xf32>
    %5 = arith.addf %2, %4 : vector<16x256xf32>
    %c0_5 = arith.constant 0 : index
    %c0_6 = arith.constant 0 : index
    %6 = vector.load %arg2[%c0_5, %c0_6] : memref<64x256xbf16, #tpu.memory_space<vmem>>, vector<64x256xbf16>
    %cst_7 = arith.constant 0.000000e+00 : f32
    %7 = vector.broadcast %cst_7 : f32 to vector<2x32xf32>
    %cst_8 = arith.constant 0.000000e+00 : f32
    %8 = vector.broadcast %cst_8 : f32 to vector<2x32xf32>
    %cst_9 = arith.constant 0.000000e+00 : f32
    %9 = vector.broadcast %cst_9 : f32 to vector<2x32xf32>
    %cst_10 = arith.constant 0.000000e+00 : f32
    %10 = vector.broadcast %cst_10 : f32 to vector<2x32xf32>
    %11 = vector.extract_strided_slice %5 {offsets = [0, 0], sizes = [2, 128], strides = [1, 1]} : vector<16x256xf32> to vector<2x128xf32>
    %12 = vector.extract_strided_slice %5 {offsets = [14, 128], sizes = [2, 128], strides = [1, 1]} : vector<16x256xf32> to vector<2x128xf32>
    %13 = tpu.concatenate %11, %12 in 1 : vector<2x128xf32>, vector<2x128xf32> -> vector<2x256xf32>
    %14 = tpu.concatenate %7, %9 in 1 : vector<2x32xf32>, vector<2x32xf32> -> vector<2x64xf32>
    %15 = arith.truncf %14 : vector<2x64xf32> to vector<2x64xbf16>
    %cst_11 = arith.constant dense<0.000000e+00> : vector<2x256xf32>
    %16 = tpu.matmul %15, %6, %cst_11 {dimension_numbers = #tpu.dot_dimension_numbers<[1], [0], [0], [1], [0, 0, 1, 1], [], []>} : vector<2x64xbf16>, vector<64x256xbf16>, vector<2x256xf32> -> vector<2x256xf32>
    %17 = arith.addf %13, %16 : vector<2x256xf32>
    %18 = vector.extract_strided_slice %17 {offsets = [0, 0], sizes = [2, 32], strides = [1, 1]} : vector<2x256xf32> to vector<2x32xf32>
    %19 = arith.negf %18 : vector<2x32xf32>
    %20 = math.exp %19 : vector<2x32xf32>
    %cst_12 = arith.constant 1.000000e+00 : f32
    %21 = vector.broadcast %cst_12 : f32 to vector<2x32xf32>
    %22 = arith.addf %21, %20 : vector<2x32xf32>
    %23 = arith.divf %21, %22 : vector<2x32xf32>
    %24 = vector.extract_strided_slice %17 {offsets = [0, 32], sizes = [2, 32], strides = [1, 1]} : vector<2x256xf32> to vector<2x32xf32>
    %25 = arith.negf %24 : vector<2x32xf32>
    %26 = math.exp %25 : vector<2x32xf32>
    %cst_13 = arith.constant 1.000000e+00 : f32
    %27 = vector.broadcast %cst_13 : f32 to vector<2x32xf32>
    %28 = arith.addf %27, %26 : vector<2x32xf32>
    %29 = arith.divf %27, %28 : vector<2x32xf32>
    %30 = vector.extract_strided_slice %17 {offsets = [0, 64], sizes = [2, 32], strides = [1, 1]} : vector<2x256xf32> to vector<2x32xf32>
    %31 = math.tanh %30 : vector<2x32xf32>
    %32 = vector.extract_strided_slice %17 {offsets = [0, 96], sizes = [2, 32], strides = [1, 1]} : vector<2x256xf32> to vector<2x32xf32>
    %33 = arith.negf %32 : vector<2x32xf32>
    %34 = math.exp %33 : vector<2x32xf32>
    %cst_14 = arith.constant 1.000000e+00 : f32
    %35 = vector.broadcast %cst_14 : f32 to vector<2x32xf32>
    %36 = arith.addf %35, %34 : vector<2x32xf32>
    %37 = arith.divf %35, %36 : vector<2x32xf32>
    %38 = vector.extract_strided_slice %17 {offsets = [0, 128], sizes = [2, 32], strides = [1, 1]} : vector<2x256xf32> to vector<2x32xf32>
    %39 = arith.negf %38 : vector<2x32xf32>
    %40 = math.exp %39 : vector<2x32xf32>
    %cst_15 = arith.constant 1.000000e+00 : f32
    %41 = vector.broadcast %cst_15 : f32 to vector<2x32xf32>
    %42 = arith.addf %41, %40 : vector<2x32xf32>
    %43 = arith.divf %41, %42 : vector<2x32xf32>
    %44 = vector.extract_strided_slice %17 {offsets = [0, 160], sizes = [2, 32], strides = [1, 1]} : vector<2x256xf32> to vector<2x32xf32>
    %45 = arith.negf %44 : vector<2x32xf32>
    %46 = math.exp %45 : vector<2x32xf32>
    %cst_16 = arith.constant 1.000000e+00 : f32
    %47 = vector.broadcast %cst_16 : f32 to vector<2x32xf32>
    %48 = arith.addf %47, %46 : vector<2x32xf32>
    %49 = arith.divf %47, %48 : vector<2x32xf32>
    %50 = vector.extract_strided_slice %17 {offsets = [0, 192], sizes = [2, 32], strides = [1, 1]} : vector<2x256xf32> to vector<2x32xf32>
    %51 = math.tanh %50 : vector<2x32xf32>
    %52 = vector.extract_strided_slice %17 {offsets = [0, 224], sizes = [2, 32], strides = [1, 1]} : vector<2x256xf32> to vector<2x32xf32>
    %53 = arith.negf %52 : vector<2x32xf32>
    %54 = math.exp %53 : vector<2x32xf32>
    %cst_17 = arith.constant 1.000000e+00 : f32
    %55 = vector.broadcast %cst_17 : f32 to vector<2x32xf32>
    %56 = arith.addf %55, %54 : vector<2x32xf32>
    %57 = arith.divf %55, %56 : vector<2x32xf32>
    %58 = arith.mulf %29, %8 : vector<2x32xf32>
    %59 = arith.mulf %23, %31 : vector<2x32xf32>
    %60 = arith.addf %58, %59 : vector<2x32xf32>
    %61 = math.tanh %60 : vector<2x32xf32>
    %62 = arith.mulf %37, %61 : vector<2x32xf32>
    %63 = arith.mulf %49, %10 : vector<2x32xf32>
    %64 = arith.mulf %43, %51 : vector<2x32xf32>
    %65 = arith.addf %63, %64 : vector<2x32xf32>
    %66 = math.tanh %65 : vector<2x32xf32>
    %67 = arith.mulf %57, %66 : vector<2x32xf32>
    %68 = vector.extract_strided_slice %5 {offsets = [2, 0], sizes = [2, 128], strides = [1, 1]} : vector<16x256xf32> to vector<2x128xf32>
    %69 = vector.extract_strided_slice %5 {offsets = [12, 128], sizes = [2, 128], strides = [1, 1]} : vector<16x256xf32> to vector<2x128xf32>
    %70 = tpu.concatenate %68, %69 in 1 : vector<2x128xf32>, vector<2x128xf32> -> vector<2x256xf32>
    %71 = tpu.concatenate %62, %67 in 1 : vector<2x32xf32>, vector<2x32xf32> -> vector<2x64xf32>
    %72 = arith.truncf %71 : vector<2x64xf32> to vector<2x64xbf16>
    %cst_18 = arith.constant dense<0.000000e+00> : vector<2x256xf32>
    %73 = tpu.matmul %72, %6, %cst_18 {dimension_numbers = #tpu.dot_dimension_numbers<[1], [0], [0], [1], [0, 0, 1, 1], [], []>} : vector<2x64xbf16>, vector<64x256xbf16>, vector<2x256xf32> -> vector<2x256xf32>
    %74 = arith.addf %70, %73 : vector<2x256xf32>
    %75 = vector.extract_strided_slice %74 {offsets = [0, 0], sizes = [2, 32], strides = [1, 1]} : vector<2x256xf32> to vector<2x32xf32>
    %76 = arith.negf %75 : vector<2x32xf32>
    %77 = math.exp %76 : vector<2x32xf32>
    %cst_19 = arith.constant 1.000000e+00 : f32
    %78 = vector.broadcast %cst_19 : f32 to vector<2x32xf32>
    %79 = arith.addf %78, %77 : vector<2x32xf32>
    %80 = arith.divf %78, %79 : vector<2x32xf32>
    %81 = vector.extract_strided_slice %74 {offsets = [0, 32], sizes = [2, 32], strides = [1, 1]} : vector<2x256xf32> to vector<2x32xf32>
    %82 = arith.negf %81 : vector<2x32xf32>
    %83 = math.exp %82 : vector<2x32xf32>
    %cst_20 = arith.constant 1.000000e+00 : f32
    %84 = vector.broadcast %cst_20 : f32 to vector<2x32xf32>
    %85 = arith.addf %84, %83 : vector<2x32xf32>
    %86 = arith.divf %84, %85 : vector<2x32xf32>
    %87 = vector.extract_strided_slice %74 {offsets = [0, 64], sizes = [2, 32], strides = [1, 1]} : vector<2x256xf32> to vector<2x32xf32>
    %88 = math.tanh %87 : vector<2x32xf32>
    %89 = vector.extract_strided_slice %74 {offsets = [0, 96], sizes = [2, 32], strides = [1, 1]} : vector<2x256xf32> to vector<2x32xf32>
    %90 = arith.negf %89 : vector<2x32xf32>
    %91 = math.exp %90 : vector<2x32xf32>
    %cst_21 = arith.constant 1.000000e+00 : f32
    %92 = vector.broadcast %cst_21 : f32 to vector<2x32xf32>
    %93 = arith.addf %92, %91 : vector<2x32xf32>
    %94 = arith.divf %92, %93 : vector<2x32xf32>
    %95 = vector.extract_strided_slice %74 {offsets = [0, 128], sizes = [2, 32], strides = [1, 1]} : vector<2x256xf32> to vector<2x32xf32>
    %96 = arith.negf %95 : vector<2x32xf32>
    %97 = math.exp %96 : vector<2x32xf32>
    %cst_22 = arith.constant 1.000000e+00 : f32
    %98 = vector.broadcast %cst_22 : f32 to vector<2x32xf32>
    %99 = arith.addf %98, %97 : vector<2x32xf32>
    %100 = arith.divf %98, %99 : vector<2x32xf32>
    %101 = vector.extract_strided_slice %74 {offsets = [0, 160], sizes = [2, 32], strides = [1, 1]} : vector<2x256xf32> to vector<2x32xf32>
    %102 = arith.negf %101 : vector<2x32xf32>
    %103 = math.exp %102 : vector<2x32xf32>
    %cst_23 = arith.constant 1.000000e+00 : f32
    %104 = vector.broadcast %cst_23 : f32 to vector<2x32xf32>
    %105 = arith.addf %104, %103 : vector<2x32xf32>
    %106 = arith.divf %104, %105 : vector<2x32xf32>
    %107 = vector.extract_strided_slice %74 {offsets = [0, 192], sizes = [2, 32], strides = [1, 1]} : vector<2x256xf32> to vector<2x32xf32>
    %108 = math.tanh %107 : vector<2x32xf32>
    %109 = vector.extract_strided_slice %74 {offsets = [0, 224], sizes = [2, 32], strides = [1, 1]} : vector<2x256xf32> to vector<2x32xf32>
    %110 = arith.negf %109 : vector<2x32xf32>
    %111 = math.exp %110 : vector<2x32xf32>
    %cst_24 = arith.constant 1.000000e+00 : f32
    %112 = vector.broadcast %cst_24 : f32 to vector<2x32xf32>
    %113 = arith.addf %112, %111 : vector<2x32xf32>
    %114 = arith.divf %112, %113 : vector<2x32xf32>
    %115 = arith.mulf %86, %60 : vector<2x32xf32>
    %116 = arith.mulf %80, %88 : vector<2x32xf32>
    %117 = arith.addf %115, %116 : vector<2x32xf32>
    %118 = math.tanh %117 : vector<2x32xf32>
    %119 = arith.mulf %94, %118 : vector<2x32xf32>
    %120 = arith.mulf %106, %65 : vector<2x32xf32>
    %121 = arith.mulf %100, %108 : vector<2x32xf32>
    %122 = arith.addf %120, %121 : vector<2x32xf32>
    %123 = math.tanh %122 : vector<2x32xf32>
    %124 = arith.mulf %114, %123 : vector<2x32xf32>
    %125 = vector.extract_strided_slice %5 {offsets = [4, 0], sizes = [2, 128], strides = [1, 1]} : vector<16x256xf32> to vector<2x128xf32>
    %126 = vector.extract_strided_slice %5 {offsets = [10, 128], sizes = [2, 128], strides = [1, 1]} : vector<16x256xf32> to vector<2x128xf32>
    %127 = tpu.concatenate %125, %126 in 1 : vector<2x128xf32>, vector<2x128xf32> -> vector<2x256xf32>
    %128 = tpu.concatenate %119, %124 in 1 : vector<2x32xf32>, vector<2x32xf32> -> vector<2x64xf32>
    %129 = arith.truncf %128 : vector<2x64xf32> to vector<2x64xbf16>
    %cst_25 = arith.constant dense<0.000000e+00> : vector<2x256xf32>
    %130 = tpu.matmul %129, %6, %cst_25 {dimension_numbers = #tpu.dot_dimension_numbers<[1], [0], [0], [1], [0, 0, 1, 1], [], []>} : vector<2x64xbf16>, vector<64x256xbf16>, vector<2x256xf32> -> vector<2x256xf32>
    %131 = arith.addf %127, %130 : vector<2x256xf32>
    %132 = vector.extract_strided_slice %131 {offsets = [0, 0], sizes = [2, 32], strides = [1, 1]} : vector<2x256xf32> to vector<2x32xf32>
    %133 = arith.negf %132 : vector<2x32xf32>
    %134 = math.exp %133 : vector<2x32xf32>
    %cst_26 = arith.constant 1.000000e+00 : f32
    %135 = vector.broadcast %cst_26 : f32 to vector<2x32xf32>
    %136 = arith.addf %135, %134 : vector<2x32xf32>
    %137 = arith.divf %135, %136 : vector<2x32xf32>
    %138 = vector.extract_strided_slice %131 {offsets = [0, 32], sizes = [2, 32], strides = [1, 1]} : vector<2x256xf32> to vector<2x32xf32>
    %139 = arith.negf %138 : vector<2x32xf32>
    %140 = math.exp %139 : vector<2x32xf32>
    %cst_27 = arith.constant 1.000000e+00 : f32
    %141 = vector.broadcast %cst_27 : f32 to vector<2x32xf32>
    %142 = arith.addf %141, %140 : vector<2x32xf32>
    %143 = arith.divf %141, %142 : vector<2x32xf32>
    %144 = vector.extract_strided_slice %131 {offsets = [0, 64], sizes = [2, 32], strides = [1, 1]} : vector<2x256xf32> to vector<2x32xf32>
    %145 = math.tanh %144 : vector<2x32xf32>
    %146 = vector.extract_strided_slice %131 {offsets = [0, 96], sizes = [2, 32], strides = [1, 1]} : vector<2x256xf32> to vector<2x32xf32>
    %147 = arith.negf %146 : vector<2x32xf32>
    %148 = math.exp %147 : vector<2x32xf32>
    %cst_28 = arith.constant 1.000000e+00 : f32
    %149 = vector.broadcast %cst_28 : f32 to vector<2x32xf32>
    %150 = arith.addf %149, %148 : vector<2x32xf32>
    %151 = arith.divf %149, %150 : vector<2x32xf32>
    %152 = vector.extract_strided_slice %131 {offsets = [0, 128], sizes = [2, 32], strides = [1, 1]} : vector<2x256xf32> to vector<2x32xf32>
    %153 = arith.negf %152 : vector<2x32xf32>
    %154 = math.exp %153 : vector<2x32xf32>
    %cst_29 = arith.constant 1.000000e+00 : f32
    %155 = vector.broadcast %cst_29 : f32 to vector<2x32xf32>
    %156 = arith.addf %155, %154 : vector<2x32xf32>
    %157 = arith.divf %155, %156 : vector<2x32xf32>
    %158 = vector.extract_strided_slice %131 {offsets = [0, 160], sizes = [2, 32], strides = [1, 1]} : vector<2x256xf32> to vector<2x32xf32>
    %159 = arith.negf %158 : vector<2x32xf32>
    %160 = math.exp %159 : vector<2x32xf32>
    %cst_30 = arith.constant 1.000000e+00 : f32
    %161 = vector.broadcast %cst_30 : f32 to vector<2x32xf32>
    %162 = arith.addf %161, %160 : vector<2x32xf32>
    %163 = arith.divf %161, %162 : vector<2x32xf32>
    %164 = vector.extract_strided_slice %131 {offsets = [0, 192], sizes = [2, 32], strides = [1, 1]} : vector<2x256xf32> to vector<2x32xf32>
    %165 = math.tanh %164 : vector<2x32xf32>
    %166 = vector.extract_strided_slice %131 {offsets = [0, 224], sizes = [2, 32], strides = [1, 1]} : vector<2x256xf32> to vector<2x32xf32>
    %167 = arith.negf %166 : vector<2x32xf32>
    %168 = math.exp %167 : vector<2x32xf32>
    %cst_31 = arith.constant 1.000000e+00 : f32
    %169 = vector.broadcast %cst_31 : f32 to vector<2x32xf32>
    %170 = arith.addf %169, %168 : vector<2x32xf32>
    %171 = arith.divf %169, %170 : vector<2x32xf32>
    %172 = arith.mulf %143, %117 : vector<2x32xf32>
    %173 = arith.mulf %137, %145 : vector<2x32xf32>
    %174 = arith.addf %172, %173 : vector<2x32xf32>
    %175 = math.tanh %174 : vector<2x32xf32>
    %176 = arith.mulf %151, %175 : vector<2x32xf32>
    %177 = arith.mulf %163, %122 : vector<2x32xf32>
    %178 = arith.mulf %157, %165 : vector<2x32xf32>
    %179 = arith.addf %177, %178 : vector<2x32xf32>
    %180 = math.tanh %179 : vector<2x32xf32>
    %181 = arith.mulf %171, %180 : vector<2x32xf32>
    %182 = vector.extract_strided_slice %5 {offsets = [6, 0], sizes = [2, 128], strides = [1, 1]} : vector<16x256xf32> to vector<2x128xf32>
    %183 = vector.extract_strided_slice %5 {offsets = [8, 128], sizes = [2, 128], strides = [1, 1]} : vector<16x256xf32> to vector<2x128xf32>
    %184 = tpu.concatenate %182, %183 in 1 : vector<2x128xf32>, vector<2x128xf32> -> vector<2x256xf32>
    %185 = tpu.concatenate %176, %181 in 1 : vector<2x32xf32>, vector<2x32xf32> -> vector<2x64xf32>
    %186 = arith.truncf %185 : vector<2x64xf32> to vector<2x64xbf16>
    %cst_32 = arith.constant dense<0.000000e+00> : vector<2x256xf32>
    %187 = tpu.matmul %186, %6, %cst_32 {dimension_numbers = #tpu.dot_dimension_numbers<[1], [0], [0], [1], [0, 0, 1, 1], [], []>} : vector<2x64xbf16>, vector<64x256xbf16>, vector<2x256xf32> -> vector<2x256xf32>
    %188 = arith.addf %184, %187 : vector<2x256xf32>
    %189 = vector.extract_strided_slice %188 {offsets = [0, 0], sizes = [2, 32], strides = [1, 1]} : vector<2x256xf32> to vector<2x32xf32>
    %190 = arith.negf %189 : vector<2x32xf32>
    %191 = math.exp %190 : vector<2x32xf32>
    %cst_33 = arith.constant 1.000000e+00 : f32
    %192 = vector.broadcast %cst_33 : f32 to vector<2x32xf32>
    %193 = arith.addf %192, %191 : vector<2x32xf32>
    %194 = arith.divf %192, %193 : vector<2x32xf32>
    %195 = vector.extract_strided_slice %188 {offsets = [0, 32], sizes = [2, 32], strides = [1, 1]} : vector<2x256xf32> to vector<2x32xf32>
    %196 = arith.negf %195 : vector<2x32xf32>
    %197 = math.exp %196 : vector<2x32xf32>
    %cst_34 = arith.constant 1.000000e+00 : f32
    %198 = vector.broadcast %cst_34 : f32 to vector<2x32xf32>
    %199 = arith.addf %198, %197 : vector<2x32xf32>
    %200 = arith.divf %198, %199 : vector<2x32xf32>
    %201 = vector.extract_strided_slice %188 {offsets = [0, 64], sizes = [2, 32], strides = [1, 1]} : vector<2x256xf32> to vector<2x32xf32>
    %202 = math.tanh %201 : vector<2x32xf32>
    %203 = vector.extract_strided_slice %188 {offsets = [0, 96], sizes = [2, 32], strides = [1, 1]} : vector<2x256xf32> to vector<2x32xf32>
    %204 = arith.negf %203 : vector<2x32xf32>
    %205 = math.exp %204 : vector<2x32xf32>
    %cst_35 = arith.constant 1.000000e+00 : f32
    %206 = vector.broadcast %cst_35 : f32 to vector<2x32xf32>
    %207 = arith.addf %206, %205 : vector<2x32xf32>
    %208 = arith.divf %206, %207 : vector<2x32xf32>
    %209 = vector.extract_strided_slice %188 {offsets = [0, 128], sizes = [2, 32], strides = [1, 1]} : vector<2x256xf32> to vector<2x32xf32>
    %210 = arith.negf %209 : vector<2x32xf32>
    %211 = math.exp %210 : vector<2x32xf32>
    %cst_36 = arith.constant 1.000000e+00 : f32
    %212 = vector.broadcast %cst_36 : f32 to vector<2x32xf32>
    %213 = arith.addf %212, %211 : vector<2x32xf32>
    %214 = arith.divf %212, %213 : vector<2x32xf32>
    %215 = vector.extract_strided_slice %188 {offsets = [0, 160], sizes = [2, 32], strides = [1, 1]} : vector<2x256xf32> to vector<2x32xf32>
    %216 = arith.negf %215 : vector<2x32xf32>
    %217 = math.exp %216 : vector<2x32xf32>
    %cst_37 = arith.constant 1.000000e+00 : f32
    %218 = vector.broadcast %cst_37 : f32 to vector<2x32xf32>
    %219 = arith.addf %218, %217 : vector<2x32xf32>
    %220 = arith.divf %218, %219 : vector<2x32xf32>
    %221 = vector.extract_strided_slice %188 {offsets = [0, 192], sizes = [2, 32], strides = [1, 1]} : vector<2x256xf32> to vector<2x32xf32>
    %222 = math.tanh %221 : vector<2x32xf32>
    %223 = vector.extract_strided_slice %188 {offsets = [0, 224], sizes = [2, 32], strides = [1, 1]} : vector<2x256xf32> to vector<2x32xf32>
    %224 = arith.negf %223 : vector<2x32xf32>
    %225 = math.exp %224 : vector<2x32xf32>
    %cst_38 = arith.constant 1.000000e+00 : f32
    %226 = vector.broadcast %cst_38 : f32 to vector<2x32xf32>
    %227 = arith.addf %226, %225 : vector<2x32xf32>
    %228 = arith.divf %226, %227 : vector<2x32xf32>
    %229 = arith.mulf %200, %174 : vector<2x32xf32>
    %230 = arith.mulf %194, %202 : vector<2x32xf32>
    %231 = arith.addf %229, %230 : vector<2x32xf32>
    %232 = math.tanh %231 : vector<2x32xf32>
    %233 = arith.mulf %208, %232 : vector<2x32xf32>
    %234 = arith.mulf %220, %179 : vector<2x32xf32>
    %235 = arith.mulf %214, %222 : vector<2x32xf32>
    %236 = arith.addf %234, %235 : vector<2x32xf32>
    %237 = math.tanh %236 : vector<2x32xf32>
    %238 = arith.mulf %228, %237 : vector<2x32xf32>
    %239 = vector.extract_strided_slice %5 {offsets = [8, 0], sizes = [2, 128], strides = [1, 1]} : vector<16x256xf32> to vector<2x128xf32>
    %240 = vector.extract_strided_slice %5 {offsets = [6, 128], sizes = [2, 128], strides = [1, 1]} : vector<16x256xf32> to vector<2x128xf32>
    %241 = tpu.concatenate %239, %240 in 1 : vector<2x128xf32>, vector<2x128xf32> -> vector<2x256xf32>
    %242 = tpu.concatenate %233, %238 in 1 : vector<2x32xf32>, vector<2x32xf32> -> vector<2x64xf32>
    %243 = arith.truncf %242 : vector<2x64xf32> to vector<2x64xbf16>
    %cst_39 = arith.constant dense<0.000000e+00> : vector<2x256xf32>
    %244 = tpu.matmul %243, %6, %cst_39 {dimension_numbers = #tpu.dot_dimension_numbers<[1], [0], [0], [1], [0, 0, 1, 1], [], []>} : vector<2x64xbf16>, vector<64x256xbf16>, vector<2x256xf32> -> vector<2x256xf32>
    %245 = arith.addf %241, %244 : vector<2x256xf32>
    %246 = vector.extract_strided_slice %245 {offsets = [0, 0], sizes = [2, 32], strides = [1, 1]} : vector<2x256xf32> to vector<2x32xf32>
    %247 = arith.negf %246 : vector<2x32xf32>
    %248 = math.exp %247 : vector<2x32xf32>
    %cst_40 = arith.constant 1.000000e+00 : f32
    %249 = vector.broadcast %cst_40 : f32 to vector<2x32xf32>
    %250 = arith.addf %249, %248 : vector<2x32xf32>
    %251 = arith.divf %249, %250 : vector<2x32xf32>
    %252 = vector.extract_strided_slice %245 {offsets = [0, 32], sizes = [2, 32], strides = [1, 1]} : vector<2x256xf32> to vector<2x32xf32>
    %253 = arith.negf %252 : vector<2x32xf32>
    %254 = math.exp %253 : vector<2x32xf32>
    %cst_41 = arith.constant 1.000000e+00 : f32
    %255 = vector.broadcast %cst_41 : f32 to vector<2x32xf32>
    %256 = arith.addf %255, %254 : vector<2x32xf32>
    %257 = arith.divf %255, %256 : vector<2x32xf32>
    %258 = vector.extract_strided_slice %245 {offsets = [0, 64], sizes = [2, 32], strides = [1, 1]} : vector<2x256xf32> to vector<2x32xf32>
    %259 = math.tanh %258 : vector<2x32xf32>
    %260 = vector.extract_strided_slice %245 {offsets = [0, 96], sizes = [2, 32], strides = [1, 1]} : vector<2x256xf32> to vector<2x32xf32>
    %261 = arith.negf %260 : vector<2x32xf32>
    %262 = math.exp %261 : vector<2x32xf32>
    %cst_42 = arith.constant 1.000000e+00 : f32
    %263 = vector.broadcast %cst_42 : f32 to vector<2x32xf32>
    %264 = arith.addf %263, %262 : vector<2x32xf32>
    %265 = arith.divf %263, %264 : vector<2x32xf32>
    %266 = vector.extract_strided_slice %245 {offsets = [0, 128], sizes = [2, 32], strides = [1, 1]} : vector<2x256xf32> to vector<2x32xf32>
    %267 = arith.negf %266 : vector<2x32xf32>
    %268 = math.exp %267 : vector<2x32xf32>
    %cst_43 = arith.constant 1.000000e+00 : f32
    %269 = vector.broadcast %cst_43 : f32 to vector<2x32xf32>
    %270 = arith.addf %269, %268 : vector<2x32xf32>
    %271 = arith.divf %269, %270 : vector<2x32xf32>
    %272 = vector.extract_strided_slice %245 {offsets = [0, 160], sizes = [2, 32], strides = [1, 1]} : vector<2x256xf32> to vector<2x32xf32>
    %273 = arith.negf %272 : vector<2x32xf32>
    %274 = math.exp %273 : vector<2x32xf32>
    %cst_44 = arith.constant 1.000000e+00 : f32
    %275 = vector.broadcast %cst_44 : f32 to vector<2x32xf32>
    %276 = arith.addf %275, %274 : vector<2x32xf32>
    %277 = arith.divf %275, %276 : vector<2x32xf32>
    %278 = vector.extract_strided_slice %245 {offsets = [0, 192], sizes = [2, 32], strides = [1, 1]} : vector<2x256xf32> to vector<2x32xf32>
    %279 = math.tanh %278 : vector<2x32xf32>
    %280 = vector.extract_strided_slice %245 {offsets = [0, 224], sizes = [2, 32], strides = [1, 1]} : vector<2x256xf32> to vector<2x32xf32>
    %281 = arith.negf %280 : vector<2x32xf32>
    %282 = math.exp %281 : vector<2x32xf32>
    %cst_45 = arith.constant 1.000000e+00 : f32
    %283 = vector.broadcast %cst_45 : f32 to vector<2x32xf32>
    %284 = arith.addf %283, %282 : vector<2x32xf32>
    %285 = arith.divf %283, %284 : vector<2x32xf32>
    %286 = arith.mulf %257, %231 : vector<2x32xf32>
    %287 = arith.mulf %251, %259 : vector<2x32xf32>
    %288 = arith.addf %286, %287 : vector<2x32xf32>
    %289 = math.tanh %288 : vector<2x32xf32>
    %290 = arith.mulf %265, %289 : vector<2x32xf32>
    %291 = arith.mulf %277, %236 : vector<2x32xf32>
    %292 = arith.mulf %271, %279 : vector<2x32xf32>
    %293 = arith.addf %291, %292 : vector<2x32xf32>
    %294 = math.tanh %293 : vector<2x32xf32>
    %295 = arith.mulf %285, %294 : vector<2x32xf32>
    %296 = vector.extract_strided_slice %5 {offsets = [10, 0], sizes = [2, 128], strides = [1, 1]} : vector<16x256xf32> to vector<2x128xf32>
    %297 = vector.extract_strided_slice %5 {offsets = [4, 128], sizes = [2, 128], strides = [1, 1]} : vector<16x256xf32> to vector<2x128xf32>
    %298 = tpu.concatenate %296, %297 in 1 : vector<2x128xf32>, vector<2x128xf32> -> vector<2x256xf32>
    %299 = tpu.concatenate %290, %295 in 1 : vector<2x32xf32>, vector<2x32xf32> -> vector<2x64xf32>
    %300 = arith.truncf %299 : vector<2x64xf32> to vector<2x64xbf16>
    %cst_46 = arith.constant dense<0.000000e+00> : vector<2x256xf32>
    %301 = tpu.matmul %300, %6, %cst_46 {dimension_numbers = #tpu.dot_dimension_numbers<[1], [0], [0], [1], [0, 0, 1, 1], [], []>} : vector<2x64xbf16>, vector<64x256xbf16>, vector<2x256xf32> -> vector<2x256xf32>
    %302 = arith.addf %298, %301 : vector<2x256xf32>
    %303 = vector.extract_strided_slice %302 {offsets = [0, 0], sizes = [2, 32], strides = [1, 1]} : vector<2x256xf32> to vector<2x32xf32>
    %304 = arith.negf %303 : vector<2x32xf32>
    %305 = math.exp %304 : vector<2x32xf32>
    %cst_47 = arith.constant 1.000000e+00 : f32
    %306 = vector.broadcast %cst_47 : f32 to vector<2x32xf32>
    %307 = arith.addf %306, %305 : vector<2x32xf32>
    %308 = arith.divf %306, %307 : vector<2x32xf32>
    %309 = vector.extract_strided_slice %302 {offsets = [0, 32], sizes = [2, 32], strides = [1, 1]} : vector<2x256xf32> to vector<2x32xf32>
    %310 = arith.negf %309 : vector<2x32xf32>
    %311 = math.exp %310 : vector<2x32xf32>
    %cst_48 = arith.constant 1.000000e+00 : f32
    %312 = vector.broadcast %cst_48 : f32 to vector<2x32xf32>
    %313 = arith.addf %312, %311 : vector<2x32xf32>
    %314 = arith.divf %312, %313 : vector<2x32xf32>
    %315 = vector.extract_strided_slice %302 {offsets = [0, 64], sizes = [2, 32], strides = [1, 1]} : vector<2x256xf32> to vector<2x32xf32>
    %316 = math.tanh %315 : vector<2x32xf32>
    %317 = vector.extract_strided_slice %302 {offsets = [0, 96], sizes = [2, 32], strides = [1, 1]} : vector<2x256xf32> to vector<2x32xf32>
    %318 = arith.negf %317 : vector<2x32xf32>
    %319 = math.exp %318 : vector<2x32xf32>
    %cst_49 = arith.constant 1.000000e+00 : f32
    %320 = vector.broadcast %cst_49 : f32 to vector<2x32xf32>
    %321 = arith.addf %320, %319 : vector<2x32xf32>
    %322 = arith.divf %320, %321 : vector<2x32xf32>
    %323 = vector.extract_strided_slice %302 {offsets = [0, 128], sizes = [2, 32], strides = [1, 1]} : vector<2x256xf32> to vector<2x32xf32>
    %324 = arith.negf %323 : vector<2x32xf32>
    %325 = math.exp %324 : vector<2x32xf32>
    %cst_50 = arith.constant 1.000000e+00 : f32
    %326 = vector.broadcast %cst_50 : f32 to vector<2x32xf32>
    %327 = arith.addf %326, %325 : vector<2x32xf32>
    %328 = arith.divf %326, %327 : vector<2x32xf32>
    %329 = vector.extract_strided_slice %302 {offsets = [0, 160], sizes = [2, 32], strides = [1, 1]} : vector<2x256xf32> to vector<2x32xf32>
    %330 = arith.negf %329 : vector<2x32xf32>
    %331 = math.exp %330 : vector<2x32xf32>
    %cst_51 = arith.constant 1.000000e+00 : f32
    %332 = vector.broadcast %cst_51 : f32 to vector<2x32xf32>
    %333 = arith.addf %332, %331 : vector<2x32xf32>
    %334 = arith.divf %332, %333 : vector<2x32xf32>
    %335 = vector.extract_strided_slice %302 {offsets = [0, 192], sizes = [2, 32], strides = [1, 1]} : vector<2x256xf32> to vector<2x32xf32>
    %336 = math.tanh %335 : vector<2x32xf32>
    %337 = vector.extract_strided_slice %302 {offsets = [0, 224], sizes = [2, 32], strides = [1, 1]} : vector<2x256xf32> to vector<2x32xf32>
    %338 = arith.negf %337 : vector<2x32xf32>
    %339 = math.exp %338 : vector<2x32xf32>
    %cst_52 = arith.constant 1.000000e+00 : f32
    %340 = vector.broadcast %cst_52 : f32 to vector<2x32xf32>
    %341 = arith.addf %340, %339 : vector<2x32xf32>
    %342 = arith.divf %340, %341 : vector<2x32xf32>
    %343 = arith.mulf %314, %288 : vector<2x32xf32>
    %344 = arith.mulf %308, %316 : vector<2x32xf32>
    %345 = arith.addf %343, %344 : vector<2x32xf32>
    %346 = math.tanh %345 : vector<2x32xf32>
    %347 = arith.mulf %322, %346 : vector<2x32xf32>
    %348 = arith.mulf %334, %293 : vector<2x32xf32>
    %349 = arith.mulf %328, %336 : vector<2x32xf32>
    %350 = arith.addf %348, %349 : vector<2x32xf32>
    %351 = math.tanh %350 : vector<2x32xf32>
    %352 = arith.mulf %342, %351 : vector<2x32xf32>
    %353 = vector.extract_strided_slice %5 {offsets = [12, 0], sizes = [2, 128], strides = [1, 1]} : vector<16x256xf32> to vector<2x128xf32>
    %354 = vector.extract_strided_slice %5 {offsets = [2, 128], sizes = [2, 128], strides = [1, 1]} : vector<16x256xf32> to vector<2x128xf32>
    %355 = tpu.concatenate %353, %354 in 1 : vector<2x128xf32>, vector<2x128xf32> -> vector<2x256xf32>
    %356 = tpu.concatenate %347, %352 in 1 : vector<2x32xf32>, vector<2x32xf32> -> vector<2x64xf32>
    %357 = arith.truncf %356 : vector<2x64xf32> to vector<2x64xbf16>
    %cst_53 = arith.constant dense<0.000000e+00> : vector<2x256xf32>
    %358 = tpu.matmul %357, %6, %cst_53 {dimension_numbers = #tpu.dot_dimension_numbers<[1], [0], [0], [1], [0, 0, 1, 1], [], []>} : vector<2x64xbf16>, vector<64x256xbf16>, vector<2x256xf32> -> vector<2x256xf32>
    %359 = arith.addf %355, %358 : vector<2x256xf32>
    %360 = vector.extract_strided_slice %359 {offsets = [0, 0], sizes = [2, 32], strides = [1, 1]} : vector<2x256xf32> to vector<2x32xf32>
    %361 = arith.negf %360 : vector<2x32xf32>
    %362 = math.exp %361 : vector<2x32xf32>
    %cst_54 = arith.constant 1.000000e+00 : f32
    %363 = vector.broadcast %cst_54 : f32 to vector<2x32xf32>
    %364 = arith.addf %363, %362 : vector<2x32xf32>
    %365 = arith.divf %363, %364 : vector<2x32xf32>
    %366 = vector.extract_strided_slice %359 {offsets = [0, 32], sizes = [2, 32], strides = [1, 1]} : vector<2x256xf32> to vector<2x32xf32>
    %367 = arith.negf %366 : vector<2x32xf32>
    %368 = math.exp %367 : vector<2x32xf32>
    %cst_55 = arith.constant 1.000000e+00 : f32
    %369 = vector.broadcast %cst_55 : f32 to vector<2x32xf32>
    %370 = arith.addf %369, %368 : vector<2x32xf32>
    %371 = arith.divf %369, %370 : vector<2x32xf32>
    %372 = vector.extract_strided_slice %359 {offsets = [0, 64], sizes = [2, 32], strides = [1, 1]} : vector<2x256xf32> to vector<2x32xf32>
    %373 = math.tanh %372 : vector<2x32xf32>
    %374 = vector.extract_strided_slice %359 {offsets = [0, 96], sizes = [2, 32], strides = [1, 1]} : vector<2x256xf32> to vector<2x32xf32>
    %375 = arith.negf %374 : vector<2x32xf32>
    %376 = math.exp %375 : vector<2x32xf32>
    %cst_56 = arith.constant 1.000000e+00 : f32
    %377 = vector.broadcast %cst_56 : f32 to vector<2x32xf32>
    %378 = arith.addf %377, %376 : vector<2x32xf32>
    %379 = arith.divf %377, %378 : vector<2x32xf32>
    %380 = vector.extract_strided_slice %359 {offsets = [0, 128], sizes = [2, 32], strides = [1, 1]} : vector<2x256xf32> to vector<2x32xf32>
    %381 = arith.negf %380 : vector<2x32xf32>
    %382 = math.exp %381 : vector<2x32xf32>
    %cst_57 = arith.constant 1.000000e+00 : f32
    %383 = vector.broadcast %cst_57 : f32 to vector<2x32xf32>
    %384 = arith.addf %383, %382 : vector<2x32xf32>
    %385 = arith.divf %383, %384 : vector<2x32xf32>
    %386 = vector.extract_strided_slice %359 {offsets = [0, 160], sizes = [2, 32], strides = [1, 1]} : vector<2x256xf32> to vector<2x32xf32>
    %387 = arith.negf %386 : vector<2x32xf32>
    %388 = math.exp %387 : vector<2x32xf32>
    %cst_58 = arith.constant 1.000000e+00 : f32
    %389 = vector.broadcast %cst_58 : f32 to vector<2x32xf32>
    %390 = arith.addf %389, %388 : vector<2x32xf32>
    %391 = arith.divf %389, %390 : vector<2x32xf32>
    %392 = vector.extract_strided_slice %359 {offsets = [0, 192], sizes = [2, 32], strides = [1, 1]} : vector<2x256xf32> to vector<2x32xf32>
    %393 = math.tanh %392 : vector<2x32xf32>
    %394 = vector.extract_strided_slice %359 {offsets = [0, 224], sizes = [2, 32], strides = [1, 1]} : vector<2x256xf32> to vector<2x32xf32>
    %395 = arith.negf %394 : vector<2x32xf32>
    %396 = math.exp %395 : vector<2x32xf32>
    %cst_59 = arith.constant 1.000000e+00 : f32
    %397 = vector.broadcast %cst_59 : f32 to vector<2x32xf32>
    %398 = arith.addf %397, %396 : vector<2x32xf32>
    %399 = arith.divf %397, %398 : vector<2x32xf32>
    %400 = arith.mulf %371, %345 : vector<2x32xf32>
    %401 = arith.mulf %365, %373 : vector<2x32xf32>
    %402 = arith.addf %400, %401 : vector<2x32xf32>
    %403 = math.tanh %402 : vector<2x32xf32>
    %404 = arith.mulf %379, %403 : vector<2x32xf32>
    %405 = arith.mulf %391, %350 : vector<2x32xf32>
    %406 = arith.mulf %385, %393 : vector<2x32xf32>
    %407 = arith.addf %405, %406 : vector<2x32xf32>
    %408 = math.tanh %407 : vector<2x32xf32>
    %409 = arith.mulf %399, %408 : vector<2x32xf32>
    %410 = vector.extract_strided_slice %5 {offsets = [14, 0], sizes = [2, 128], strides = [1, 1]} : vector<16x256xf32> to vector<2x128xf32>
    %411 = vector.extract_strided_slice %5 {offsets = [0, 128], sizes = [2, 128], strides = [1, 1]} : vector<16x256xf32> to vector<2x128xf32>
    %412 = tpu.concatenate %410, %411 in 1 : vector<2x128xf32>, vector<2x128xf32> -> vector<2x256xf32>
    %413 = tpu.concatenate %404, %409 in 1 : vector<2x32xf32>, vector<2x32xf32> -> vector<2x64xf32>
    %414 = arith.truncf %413 : vector<2x64xf32> to vector<2x64xbf16>
    %cst_60 = arith.constant dense<0.000000e+00> : vector<2x256xf32>
    %415 = tpu.matmul %414, %6, %cst_60 {dimension_numbers = #tpu.dot_dimension_numbers<[1], [0], [0], [1], [0, 0, 1, 1], [], []>} : vector<2x64xbf16>, vector<64x256xbf16>, vector<2x256xf32> -> vector<2x256xf32>
    %416 = arith.addf %412, %415 : vector<2x256xf32>
    %417 = vector.extract_strided_slice %416 {offsets = [0, 0], sizes = [2, 32], strides = [1, 1]} : vector<2x256xf32> to vector<2x32xf32>
    %418 = arith.negf %417 : vector<2x32xf32>
    %419 = math.exp %418 : vector<2x32xf32>
    %cst_61 = arith.constant 1.000000e+00 : f32
    %420 = vector.broadcast %cst_61 : f32 to vector<2x32xf32>
    %421 = arith.addf %420, %419 : vector<2x32xf32>
    %422 = arith.divf %420, %421 : vector<2x32xf32>
    %423 = vector.extract_strided_slice %416 {offsets = [0, 32], sizes = [2, 32], strides = [1, 1]} : vector<2x256xf32> to vector<2x32xf32>
    %424 = arith.negf %423 : vector<2x32xf32>
    %425 = math.exp %424 : vector<2x32xf32>
    %cst_62 = arith.constant 1.000000e+00 : f32
    %426 = vector.broadcast %cst_62 : f32 to vector<2x32xf32>
    %427 = arith.addf %426, %425 : vector<2x32xf32>
    %428 = arith.divf %426, %427 : vector<2x32xf32>
    %429 = vector.extract_strided_slice %416 {offsets = [0, 64], sizes = [2, 32], strides = [1, 1]} : vector<2x256xf32> to vector<2x32xf32>
    %430 = math.tanh %429 : vector<2x32xf32>
    %431 = vector.extract_strided_slice %416 {offsets = [0, 96], sizes = [2, 32], strides = [1, 1]} : vector<2x256xf32> to vector<2x32xf32>
    %432 = arith.negf %431 : vector<2x32xf32>
    %433 = math.exp %432 : vector<2x32xf32>
    %cst_63 = arith.constant 1.000000e+00 : f32
    %434 = vector.broadcast %cst_63 : f32 to vector<2x32xf32>
    %435 = arith.addf %434, %433 : vector<2x32xf32>
    %436 = arith.divf %434, %435 : vector<2x32xf32>
    %437 = vector.extract_strided_slice %416 {offsets = [0, 128], sizes = [2, 32], strides = [1, 1]} : vector<2x256xf32> to vector<2x32xf32>
    %438 = arith.negf %437 : vector<2x32xf32>
    %439 = math.exp %438 : vector<2x32xf32>
    %cst_64 = arith.constant 1.000000e+00 : f32
    %440 = vector.broadcast %cst_64 : f32 to vector<2x32xf32>
    %441 = arith.addf %440, %439 : vector<2x32xf32>
    %442 = arith.divf %440, %441 : vector<2x32xf32>
    %443 = vector.extract_strided_slice %416 {offsets = [0, 160], sizes = [2, 32], strides = [1, 1]} : vector<2x256xf32> to vector<2x32xf32>
    %444 = arith.negf %443 : vector<2x32xf32>
    %445 = math.exp %444 : vector<2x32xf32>
    %cst_65 = arith.constant 1.000000e+00 : f32
    %446 = vector.broadcast %cst_65 : f32 to vector<2x32xf32>
    %447 = arith.addf %446, %445 : vector<2x32xf32>
    %448 = arith.divf %446, %447 : vector<2x32xf32>
    %449 = vector.extract_strided_slice %416 {offsets = [0, 192], sizes = [2, 32], strides = [1, 1]} : vector<2x256xf32> to vector<2x32xf32>
    %450 = math.tanh %449 : vector<2x32xf32>
    %451 = vector.extract_strided_slice %416 {offsets = [0, 224], sizes = [2, 32], strides = [1, 1]} : vector<2x256xf32> to vector<2x32xf32>
    %452 = arith.negf %451 : vector<2x32xf32>
    %453 = math.exp %452 : vector<2x32xf32>
    %cst_66 = arith.constant 1.000000e+00 : f32
    %454 = vector.broadcast %cst_66 : f32 to vector<2x32xf32>
    %455 = arith.addf %454, %453 : vector<2x32xf32>
    %456 = arith.divf %454, %455 : vector<2x32xf32>
    %457 = arith.mulf %428, %402 : vector<2x32xf32>
    %458 = arith.mulf %422, %430 : vector<2x32xf32>
    %459 = arith.addf %457, %458 : vector<2x32xf32>
    %460 = math.tanh %459 : vector<2x32xf32>
    %461 = arith.mulf %436, %460 : vector<2x32xf32>
    %462 = arith.mulf %448, %407 : vector<2x32xf32>
    %463 = arith.mulf %442, %450 : vector<2x32xf32>
    %464 = arith.addf %462, %463 : vector<2x32xf32>
    %465 = math.tanh %464 : vector<2x32xf32>
    %466 = arith.mulf %456, %465 : vector<2x32xf32>
    %467 = tpu.concatenate %62, %466 in 1 : vector<2x32xf32>, vector<2x32xf32> -> vector<2x64xf32>
    %468 = tpu.concatenate %119, %409 in 1 : vector<2x32xf32>, vector<2x32xf32> -> vector<2x64xf32>
    %469 = tpu.concatenate %176, %352 in 1 : vector<2x32xf32>, vector<2x32xf32> -> vector<2x64xf32>
    %470 = tpu.concatenate %233, %295 in 1 : vector<2x32xf32>, vector<2x32xf32> -> vector<2x64xf32>
    %471 = tpu.concatenate %290, %238 in 1 : vector<2x32xf32>, vector<2x32xf32> -> vector<2x64xf32>
    %472 = tpu.concatenate %347, %181 in 1 : vector<2x32xf32>, vector<2x32xf32> -> vector<2x64xf32>
    %473 = tpu.concatenate %404, %124 in 1 : vector<2x32xf32>, vector<2x32xf32> -> vector<2x64xf32>
    %474 = tpu.concatenate %461, %67 in 1 : vector<2x32xf32>, vector<2x32xf32> -> vector<2x64xf32>
    %475 = vector.shape_cast %467 : vector<2x64xf32> to vector<2x1x64xf32>
    %476 = vector.shape_cast %468 : vector<2x64xf32> to vector<2x1x64xf32>
    %477 = vector.shape_cast %469 : vector<2x64xf32> to vector<2x1x64xf32>
    %478 = vector.shape_cast %470 : vector<2x64xf32> to vector<2x1x64xf32>
    %479 = vector.shape_cast %471 : vector<2x64xf32> to vector<2x1x64xf32>
    %480 = vector.shape_cast %472 : vector<2x64xf32> to vector<2x1x64xf32>
    %481 = vector.shape_cast %473 : vector<2x64xf32> to vector<2x1x64xf32>
    %482 = vector.shape_cast %474 : vector<2x64xf32> to vector<2x1x64xf32>
    %483 = tpu.concatenate %475, %476, %477, %478, %479, %480, %481, %482 in 1 : vector<2x1x64xf32>, vector<2x1x64xf32>, vector<2x1x64xf32>, vector<2x1x64xf32>, vector<2x1x64xf32>, vector<2x1x64xf32>, vector<2x1x64xf32>, vector<2x1x64xf32> -> vector<2x8x64xf32>
    %c0_67 = arith.constant 0 : index
    %c0_68 = arith.constant 0 : index
    %484 = vector.load %arg4[%c0_67, %c0_68] : memref<1x64xf32, #tpu.memory_space<vmem>>, vector<1x64xf32>
    %485 = vector.shape_cast %484 : vector<1x64xf32> to vector<1x1x64xf32>
    %486 = vector.broadcast %485 : vector<1x1x64xf32> to vector<2x8x64xf32>
    %487 = arith.mulf %483, %486 : vector<2x8x64xf32>
    %cst_69 = arith.constant dense<0.000000e+00> : vector<2x8xf32>
    %488 = vector.multi_reduction <add>, %487, %cst_69 [2] : vector<2x8x64xf32> to vector<2x8xf32>
    %489 = math.tanh %488 : vector<2x8xf32>
    %490 = math.exp %489 : vector<2x8xf32>
    %cst_70 = arith.constant dense<0.000000e+00> : vector<2xf32>
    %491 = vector.multi_reduction <add>, %490, %cst_70 [1] : vector<2x8xf32> to vector<2xf32>
    %492 = vector.shape_cast %491 : vector<2xf32> to vector<2x1xf32>
    %493 = vector.broadcast %492 : vector<2x1xf32> to vector<2x8xf32>
    %494 = arith.divf %490, %493 : vector<2x8xf32>
    %cst_71 = arith.constant 1.000000e-10 : f32
    %495 = vector.broadcast %cst_71 : f32 to vector<2x8xf32>
    %496 = arith.addf %494, %495 : vector<2x8xf32>
    %497 = vector.shape_cast %496 : vector<2x8xf32> to vector<2x8x1xf32>
    %498 = vector.broadcast %497 : vector<2x8x1xf32> to vector<2x8x64xf32>
    %499 = arith.mulf %483, %498 : vector<2x8x64xf32>
    %cst_72 = arith.constant dense<0.000000e+00> : vector<2x64xf32>
    %500 = vector.multi_reduction <add>, %499, %cst_72 [1] : vector<2x8x64xf32> to vector<2x64xf32>
    %cst_73 = arith.constant dense<0.000000e+00> : vector<2x64xf32>
    %501 = vector.multi_reduction <add>, %483, %cst_73 [1] : vector<2x8x64xf32> to vector<2x64xf32>
    %cst_74 = arith.constant 8.000000e+00 : f32
    %502 = vector.broadcast %cst_74 : f32 to vector<2x64xf32>
    %503 = arith.divf %501, %502 : vector<2x64xf32>
    %cst_75 = arith.constant dense<0xFF800000> : vector<2x64xf32>
    %504 = vector.multi_reduction <maximumf>, %483, %cst_75 [1] : vector<2x8x64xf32> to vector<2x64xf32>
    %505 = tpu.concatenate %500, %504, %503 in 1 : vector<2x64xf32>, vector<2x64xf32>, vector<2x64xf32> -> vector<2x192xf32>
    %506 = arith.truncf %505 : vector<2x192xf32> to vector<2x192xbf16>
    %c0_76 = arith.constant 0 : index
    %c0_77 = arith.constant 0 : index
    %507 = vector.load %arg5[%c0_76, %c0_77] : memref<192x192xbf16, #tpu.memory_space<vmem>>, vector<192x192xbf16>
    %cst_78 = arith.constant dense<0.000000e+00> : vector<2x192xf32>
    %508 = tpu.matmul %506, %507, %cst_78 {dimension_numbers = #tpu.dot_dimension_numbers<[1], [0], [0], [1], [0, 0, 1, 1], [], []>} : vector<2x192xbf16>, vector<192x192xbf16>, vector<2x192xf32> -> vector<2x192xf32>
    %c0_79 = arith.constant 0 : index
    %c0_80 = arith.constant 0 : index
    %509 = vector.load %arg6[%c0_79, %c0_80] : memref<1x192xf32, #tpu.memory_space<vmem>>, vector<1x192xf32>
    %510 = vector.broadcast %509 : vector<1x192xf32> to vector<2x192xf32>
    %511 = arith.addf %508, %510 : vector<2x192xf32>
    %cst_81 = arith.constant 0.000000e+00 : f32
    %512 = vector.broadcast %cst_81 : f32 to vector<2x192xf32>
    %513 = arith.maximumf %511, %512 : vector<2x192xf32>
    %514 = arith.addf %505, %513 : vector<2x192xf32>
    %515 = arith.truncf %514 : vector<2x192xf32> to vector<2x192xbf16>
    %c0_82 = arith.constant 0 : index
    %c0_83 = arith.constant 0 : index
    %516 = vector.load %arg7[%c0_82, %c0_83] : memref<192x3xbf16, #tpu.memory_space<vmem>>, vector<192x3xbf16>
    %cst_84 = arith.constant dense<0.000000e+00> : vector<2x3xf32>
    %517 = tpu.matmul %515, %516, %cst_84 {dimension_numbers = #tpu.dot_dimension_numbers<[1], [0], [0], [1], [0, 0, 1, 1], [], []>} : vector<2x192xbf16>, vector<192x3xbf16>, vector<2x3xf32> -> vector<2x3xf32>
    %c0_85 = arith.constant 0 : index
    %c0_86 = arith.constant 0 : index
    %518 = vector.load %arg8[%c0_85, %c0_86] : memref<1x3xf32, #tpu.memory_space<vmem>>, vector<1x3xf32>
    %519 = vector.broadcast %518 : vector<1x3xf32> to vector<2x3xf32>
    %520 = arith.addf %517, %519 : vector<2x3xf32>
    %c0_87 = arith.constant 0 : index
    %c0_88 = arith.constant 0 : index
    %521 = vector.load %arg9[%c0_87, %c0_88] : memref<2x3xf32, #tpu.memory_space<vmem>>, vector<2x3xf32>
    tpu.vector_store %arg9[%c0_87, %c0_88], %520 {strides = array<i32>} : memref<2x3xf32, #tpu.memory_space<vmem>>, vector<2x3xf32>,
    %c0_89 = arith.constant 0 : index
    %c0_90 = arith.constant 0 : index
    %522 = vector.load %arg10[%c0_89, %c0_90] : memref<2x8xf32, #tpu.memory_space<vmem>>, vector<2x8xf32>
    tpu.vector_store %arg10[%c0_89, %c0_90], %496 {strides = array<i32>} : memref<2x8xf32, #tpu.memory_space<vmem>>, vector<2x8xf32>,
    return
  }
}

</mosaic_0001>

<bundles_post_ra>
// kernel: tpu_custom_call.1
= control target key start
LH: loop header
LB: loop body
LE: loop exit
PB: predicated region body
PF: predicated region fallthrough
CT: control target
= control target key end

     0   :  { %16 = vsyncpa [#allocation3], 0  ;;  %s2942_s0 = inlined_call_operand.vmem [shape: bf16[16,16], index: 0, kind: input, shape index: {}]   ;;  %s2943_s1 = inlined_call_operand.vmem [shape: bf16[16,256], index: 1, kind: input, shape index: {}]   ;;  %s2944_s2 = inlined_call_operand.vmem [shape: bf16[64,256], index: 2, kind: input, shape index: {}]   ;;  %s2945_s3 = inlined_call_operand.vmem [shape: f32[1,256], index: 3, kind: input, shape index: {}]   ;;  %s2946_s4 = inlined_call_operand.vmem [shape: f32[1,64], index: 4, kind: input, shape index: {}]   ;;  %s2947_s5 = inlined_call_operand.hbm [shape: bf16[192,192], index: 5, kind: input, shape index: {}]   ;;  %s2948_s6 = inlined_call_operand.vmem [shape: f32[1,192], index: 6, kind: input, shape index: {}]   ;;  %s2949_s7 = inlined_call_operand.vmem [shape: bf16[192,3], index: 7, kind: input, shape index: {}]   ;;  %s2950_s8 = inlined_call_operand.vmem [shape: f32[1,3], index: 8, kind: input, shape index: {}]   ;;  %s2951_s9 = inlined_call_operand.hbm [shape: f32[2,3], index: 9, kind: output, shape index: {0}]   ;;  %s2952_s10 = inlined_call_operand.hbm [shape: f32[2,8], index: 10, kind: output, shape index: {1}]  }
   0x1   :  { %17 = vsyncpa [#allocation4], 0 }
   0x2   :  { %18 = vsyncpa [#allocation7], 0  ;;  %s2322_s13 = smov [#allocation2]   ;;  %s2250_s17 = scalar_lea.hbm %s2947_s5, 3072 }
   0x3   :  { %s34_s14 = sshll.u32 %s2322_s13, 4  ;;  %p2251_p0 = scmp.ne.s32.totalorder %s2947_s5, %s2250_s17  ;;  %s35_s14 = int_to_ptr.vmem [resolvable:$true] %s34_s14 }
   0x4   :  { %p2254_p1 = scmp.lt.u32.totalorder %s2250_s17, %s2947_s5 }
   0x6   :  { %p2256_p2 = pnand %p2254_p1, %p2251_p0 }
   0x8   :  { %2259 = shalt.err (!%p2256_p2)
}
   0x9   :  { %s2260_s22 = scalar_lea.vmem %s35_s14, 3072  ;;  %p2265_p4 = scmp.lt.s32.totalorder %s35_s14, %s35_s14 }
   0xa   :  { %p2261_p3 = scmp.ne.s32.totalorder %s35_s14, %s2260_s22  ;;  %p2266_p5 = scmp.lt.s32.totalorder %s2260_s22, %s2260_s22 }
   0xc   :  { %p2267_p6 = por %p2266_p5, %p2265_p4 }
   0xe   :  { %p2268_p7 = pnand %p2267_p6, %p2261_p3 }
  0x10   :  { %2271 = shalt.err (!%p2268_p7)
}
  0x11   :  { %s2323_s23 = smov 128   ;;  %s2324_s24 = smov 8  }
  0x12   :  { %40 = dma.hbm_to_vmem [thread:$0]  %s2947_s5, 3072, %s35_s14, [#allocation3], %s2323_s23, %s2323_s23, %s2324_s24  }
  0x13   :  { %2316 = dma.done.wait [#allocation3], 3072  }
  0x14   :  { %2317 = vsyncadd [#allocation3], 4294964224  ;;  %v2325_v0 = vmov 0   ;;  %v2406_v1 = vld [vmem:[%s2944_s2 + $0x4] ss:$8 sps:$4 sm:$0xff]   ;;  %vm82_vm0 = vcmask 130048   ;;  %v57_v13 = vlaneseq }
  0x15   :  { %118 = vmatprep.mubr.bf16.mxu0 %v2325_v0  ;;  %217 = vmatprep.mubr.bf16.mxu1 %v2325_v0  ;;  %v2411_v2 = vld [vmem:[%s2944_s2] ss:$8 sps:$4 sm:$0xff]   ;;  %v2417_v3 = vld [vmem:[%s2944_s2 + $0x14] ss:$8 sps:$4 sm:$0xff]   ;;  %v2422_v4 = vld [vmem:[%s2944_s2 + $0x10] ss:$8 sps:$4 sm:$0xff]  }
  0x16   :  { %2045 = vset.pattern.permute.xlu0 %v2325_v0  ;;  %2044 = vset.pattern.permute.xlu1 %v2325_v0  ;;  %v2052_v5 = vld [vmem:[%s2943_s1 + $0x4] ss:$8 sps:$4 sm:$0xff]   ;;  %v2054_v6 = vld [vmem:[%s2943_s1] ss:$8 sps:$4 sm:$0xff]   ;;  %v2449_v10 = vld [vmem:[%s2944_s2 + $0x34] ss:$8 sps:$4 sm:$0xff]  }
  0x17   :  { %185 = vmatprep.subr.bf16.mxu1 %v2406_v1  ;;  %v2435_v7 = vld [vmem:[%s2944_s2 + $0x24] ss:$8 sps:$4 sm:$0xff]   ;;  %86 = vmatprep.subr.bf16.mxu0 %v2052_v5  ;;  %v2444_v9 = vld [vmem:[%s2944_s2 + $0x20] ss:$8 sps:$4 sm:$0xff]   ;;  %v2456_v11 = vld [vmem:[%s2944_s2 + $0x30] ss:$8 sps:$4 sm:$0xff]  }
  0x18   :  { %186 = vmatpush1.bf16.msra.mxu1 %v2411_v2  ;;  %87 = vmatpush1.bf16.msra.mxu0 %v2054_v6  ;;  %v2058_v8 = vld [vmem:[%s2942_s0] sm:$0xff]   ;;  %v2326_v12 = vmov 0.0|0.0   ;;  %v2481_v14 = vshrl.u32 %v57_v13, 7  ;;  %s2328_s27 = smov 32   ;;  %vm286_vm1 = vcmask 261120   ;;  %vm181_vm2 = vcmask 523264  }
  0x19   :  { %187 = vmatprep.subr.bf16.mxu1 %v2417_v3  ;;  %292 = vmatprep.subr.bf16.mxu0 %v2406_v1  ;;  %v55_v16 = vld [vmem:[%s2945_s3] sm:$0x3]  ;;  %s2327_s3 = smov 64   ;;  %vm1413_vm3 = vcmask 1040384   ;;  %vm1416_vm4 = vcmask 1041408   ;;  %vm1419_vm5 = vcmask 1042432  }
  0x1a   :  { %v2484_v15 = vsub.s32 1, %v2481_v14  ;;  %v2490_v17 = vsub.s32 0, %v2481_v14  ;;  %vm1422_vm6 = vcmask 1043456   ;;  %vm1425_vm7 = vcmask 1044480  }
  0x1b   :  { %1962 = vmatmul.mubr.msk.bf16.vlgmr.msra.gmra.mrb[0].mxu0 %vm82_vm0, %v2058_v8  ;;  %vm1428_vm8 = vcmask 1045504   ;;  %vm1431_vm9 = vcmask 1046528   ;;  %vm1467_vm10 = vcmask 1041409   ;;  %vm1470_vm11 = vcmask 58368  }
  0x1c   :  { %188 = vmatpush1.bf16.msra.mxu1 %v2422_v4  ;;  %293 = vmatpush1.bf16.msra.mxu0 %v2411_v2  ;;  %v64_v18 = vrot.slane %v55_v16, %v2484_v15  ;;  %v60_v19 = vrot.slane %v55_v16, %v2490_v17 }
  0x1d   :  { %189 = vmatprep.subr.bf16.mxu1 %v2435_v7  ;;  %324 = vmatprep.mubr.bf16.mxu0 %v2325_v0 }
  0x1e   :  { %294 = vmatprep.subr.bf16.mxu0 %v2417_v3 }
  0x20   :  { %190 = vmatpush1.bf16.msra.mxu1 %v2444_v9  ;;  %295 = vmatpush1.bf16.msra.mxu0 %v2422_v4 }
  0x21   :  { %191 = vmatprep.subr.bf16.mxu1 %v2449_v10  ;;  %296 = vmatprep.subr.bf16.mxu0 %v2435_v7 }
  0x24   :  { %192 = vmatpush1.bf16.msra.mxu1 %v2456_v11  ;;  %297 = vmatpush1.bf16.msra.mxu0 %v2444_v9 }
  0x25   :  { %410 = vmatprep.subr.bf16.mxu1 %v2406_v1  ;;  %298 = vmatprep.subr.bf16.mxu0 %v2449_v10 }
  0x27   :  { %218 = vmatmul.mubr.bf16.vlgmr.msra.gmra.mrb[0].mxu1 %v2326_v12 }
  0x28   :  { %411 = vmatpush1.bf16.msra.mxu1 %v2411_v2  ;;  %442 = vmatprep.mubr.bf16.mxu1 %v2325_v0 }
  0x29   :  { %412 = vmatprep.subr.bf16.mxu1 %v2417_v3  ;;  %299 = vmatpush1.bf16.msra.mxu0 %v2456_v11 }
  0x2a   :  { %528 = vmatprep.subr.bf16.mxu0 %v2406_v1 }
  0x2c   :  { %413 = vmatpush1.bf16.msra.mxu1 %v2422_v4 }
  0x2d   :  { %414 = vmatprep.subr.bf16.mxu1 %v2435_v7 }
  0x30   :  { %415 = vmatpush1.bf16.msra.mxu1 %v2444_v9 }
  0x31   :  { %416 = vmatprep.subr.bf16.mxu1 %v2449_v10 }
  0x34   :  { %417 = vmatpush1.bf16.msra.mxu1 %v2456_v11 }
  0x35   :  { %649 = vmatprep.subr.bf16.mxu1 %v2406_v1 }
  0xee   :  { %v120_v20 = vpop.f32.mrb[0].mxu0 }
  0xef   :  { %v122_v21 = vpop.f32.mrb[1].mxu0  ;;  %v2500_v27 = vadd.f32 %v120_v20, %v60_v19 }
  0xf0   :  { %v2494_v22 = vadd.f32 %v122_v21, %v64_v18  ;;  %v124_v23 = vpop.f32.mrb[2].mxu0 }
  0xf1   :  { %v2496_v24 = vadd.f32 %v124_v23, %v60_v19  ;;  %v126_v25 = vpop.f32.mrb[3].mxu0 }
  0xf2   :  { %v2498_v26 = vadd.f32 %v126_v25, %v64_v18 }
  0xf4   :  { %v138_v28 = vrot.slane %v2498_v26, 6  ;;  %v276_v16 = vrot.slane %v2498_v26, 2 }
  0xfa   :  { %v219_v29 = vpop.f32.mrb[0].mxu1 }
  0xfb   :  { %v226_v30 = vadd.f32 %v219_v29, %v2500_v27  ;;  %v221_v31 = vpop.f32.mrb[1].mxu1 }
  0xfc   :  { %v223_v32 = vpop.f32.mrb[2].mxu1  ;;  %v227_v33 = vadd.f32 %v221_v31, %v138_v28 }
  0xfd   :  { %2110 = vtanh.f32 %v226_v30  ;;  %v224_v34 = vpop.f32.mrb[3].mxu1  ;;  %v1971_v37 = vmul.f32 -1.442695, %v226_v30 }
  0xfe   :  { %2112 = vtanh.f32 %v227_v33  ;;  %v1972_v38 = vmul.f32 -1.442695, %v227_v33 }
  0xff   :  { %2114 = vpow2.f32 %v1971_v37 }
 0x100   :  { %2116 = vpow2.f32 %v1972_v38 }
 0x107   :  { %v2111_v35 = vpop.eup %2110 }
 0x108   :  { %244 = vrot.lane.b32.xlu0 %v2111_v35, %s2327_s3  ;;  %v2113_v36 = vpop.eup %2112 }
 0x109   :  { %v2115_v39 = vpop.eup %2114 }
 0x10a   :  { %v231_v40 = vadd.f32 1.0, %v2115_v39  ;;  %v2117_v41 = vpop.eup %2116 }
 0x10b   :  { %v238_v42 = vadd.f32 1.0, %v2117_v41 }
 0x10c   :  { %261 = vrot.lane.b32.xlu0 %v2113_v36, %s2327_s3  ;;  %2118 = vrcp.f32 %v231_v40 }
 0x10d   :  { %2120 = vrcp.f32 %v238_v42 }
 0x116   :  { %v2119_v43 = vpop.eup %2118 }
 0x117   :  { %v2121_v46 = vpop.eup %2120  ;;  %v242_v49 = vmul.f32 0.0, %v2119_v43 }
 0x118   :  { %v259_v52 = vmul.f32 0.0, %v2121_v46 }
 0x17a   :  { %v245_v44 = vpop.permute.xlu0 %244 }
 0x17b   :  { %v247_v45 = vmul.f32 %v2119_v43, %v245_v44 }
 0x17d   :  { %249 = vrot.lane.b32.xlu1 %v247_v45, %s2328_s27 }
 0x17e   :  { %v262_v47 = vpop.permute.xlu0 %261 }
 0x17f   :  { %v264_v48 = vmul.f32 %v2121_v46, %v262_v47 }
 0x181   :  { %266 = vrot.lane.b32.xlu1 %v264_v48, %s2328_s27 }
 0x1ef   :  { %v250_v50 = vpop.permute.xlu1 %249 }
 0x1f0   :  { %v2510_v51 = vadd.f32 %v250_v50, %v242_v49 }
 0x1f2   :  { %2122 = vtanh.f32 %v2510_v51  ;;  %v356_v42 = vrot.slane %v2510_v51, 6 }
 0x1f3   :  { %v267_v53 = vpop.permute.xlu1 %266 }
 0x1f4   :  { %v2513_v54 = vadd.f32 %v267_v53, %v259_v52 }
 0x1f6   :  { %2124 = vtanh.f32 %v2513_v54 }
 0x1fc   :  { %v2123_v55 = vpop.eup %2122 }
 0x1fd   :  { %255 = vrot.lane.b32.xlu0 %v2123_v55, %s2327_s3 }
 0x200   :  { %v2125_v56 = vpop.eup %2124 }
 0x201   :  { %272 = vrot.lane.b32.xlu1 %v2125_v56, %s2327_s3 }
 0x26f   :  { %v256_v57 = vpop.permute.xlu0 %255 }
 0x270   :  { %v258_v58 = vmul.f32 %v2119_v43, %v256_v57  ;;  %v376_v43 = vrot.slane %v2513_v54, 6 }
 0x272   :  { %279 = vrot.lane.b32.xlu0 %v258_v58, %s2328_s27 }
 0x273   :  { %v273_v59 = vpop.permute.xlu1 %272 }
 0x274   :  { %v2519_v60 = vmul.f32 %v2121_v46, %v273_v59 }
 0x276   :  { %283 = vrot.lane.b32.xlu1 %v2519_v60, %s2327_s3 }
 0x2e4   :  { %v2523_v61 = vpop.permute.xlu0 %279 }
 0x2e8   :  { %v284_v62 = vpop.permute.xlu1 %283 }
 0x2e9   :  { %v287_v63 = vsel %vm286_vm1, %v2523_v61, %v284_v62 }
 0x2ea   :  { %v288_v5 = vpack.c.bf16 %v287_v63, %v287_v63 }
 0x2ec   :  { %1973 = vmatmul.mubr.msk.bf16.vlgmr.msra.gmra.mrb[4].mxu0 %vm181_vm2, %v288_v5 }
 0x2ed   :  { %529 = vmatpush1.bf16.msra.mxu0 %v2411_v2  ;;  %560 = vmatprep.mubr.bf16.mxu0 %v2325_v0 }
 0x2ee   :  { %530 = vmatprep.subr.bf16.mxu0 %v2417_v3 }
 0x2f1   :  { %531 = vmatpush1.bf16.msra.mxu0 %v2422_v4 }
 0x2f2   :  { %532 = vmatprep.subr.bf16.mxu0 %v2435_v7 }
 0x2f5   :  { %533 = vmatpush1.bf16.msra.mxu0 %v2444_v9 }
 0x2f6   :  { %534 = vmatprep.subr.bf16.mxu0 %v2449_v10 }
 0x2f9   :  { %535 = vmatpush1.bf16.msra.mxu0 %v2456_v11 }
 0x2fa   :  { %761 = vmatprep.subr.bf16.mxu0 %v2406_v1 }
 0x3bf   :  { %v326_v6 = vpop.f32.mrb[4].mxu0 }
 0x3c0   :  { %v335_v8 = vrot.slane %v326_v6, 6  ;;  %v328_v12 = vpop.f32.mrb[5].mxu0 }
 0x3c1   :  { %v336_v18 = vrot.slane %v328_v12, 6  ;;  %v330_v19 = vpop.f32.mrb[6].mxu0 }
 0x3c2   :  { %v339_v20 = vadd.f32 %v335_v8, %v2500_v27  ;;  %v331_v21 = vpop.f32.mrb[7].mxu0 }
 0x3c3   :  { %v340_v23 = vadd.f32 %v336_v18, %v276_v16 }
 0x3c4   :  { %2126 = vtanh.f32 %v339_v20  ;;  %v1974_v30 = vmul.f32 -1.442695, %v339_v20 }
 0x3c5   :  { %2128 = vtanh.f32 %v340_v23  ;;  %v1975_v31 = vmul.f32 -1.442695, %v340_v23 }
 0x3c6   :  { %2130 = vpow2.f32 %v1974_v30 }
 0x3c7   :  { %2132 = vpow2.f32 %v1975_v31 }
 0x3ce   :  { %v2127_v25 = vpop.eup %2126 }
 0x3cf   :  { %v2129_v29 = vpop.eup %2128  ;;  %360 = vrot.lane.b32.xlu0 %v2127_v25, %s2327_s3 }
 0x3d0   :  { %380 = vrot.lane.b32.xlu1 %v2129_v29, %s2327_s3  ;;  %v2131_v32 = vpop.eup %2130 }
 0x3d1   :  { %v2133_v33 = vpop.eup %2132  ;;  %v344_v34 = vadd.f32 1.0, %v2131_v32 }
 0x3d2   :  { %v351_v35 = vadd.f32 1.0, %v2133_v33 }
 0x3d3   :  { %2134 = vrcp.f32 %v344_v34 }
 0x3d4   :  { %2136 = vrcp.f32 %v351_v35 }
 0x3dd   :  { %v2135_v36 = vpop.eup %2134 }
 0x3de   :  { %v2137_v38 = vpop.eup %2136  ;;  %v358_v44 = vmul.f32 %v2135_v36, %v356_v42 }
 0x3df   :  { %v378_v46 = vmul.f32 %v2137_v38, %v376_v43 }
 0x441   :  { %v361_v37 = vpop.permute.xlu0 %360 }
 0x442   :  { %v363_v39 = vmul.f32 %v2135_v36, %v361_v37  ;;  %v381_v40 = vpop.permute.xlu1 %380 }
 0x443   :  { %v383_v41 = vmul.f32 %v2137_v38, %v381_v40 }
 0x444   :  { %365 = vrot.lane.b32.xlu0 %v363_v39, %s2328_s27 }
 0x445   :  { %385 = vrot.lane.b32.xlu1 %v383_v41, %s2328_s27 }
 0x4b6   :  { %v366_v45 = vpop.permute.xlu0 %365 }
 0x4b7   :  { %v2547_v47 = vadd.f32 %v366_v45, %v358_v44  ;;  %v386_v48 = vpop.permute.xlu1 %385 }
 0x4b8   :  { %v2549_v49 = vadd.f32 %v386_v48, %v378_v46 }
 0x4b9   :  { %2138 = vtanh.f32 %v2547_v47  ;;  %v474_v39 = vrot.slane %v2547_v47, 6 }
 0x4ba   :  { %2140 = vtanh.f32 %v2549_v49  ;;  %v494_v40 = vrot.slane %v2549_v49, 6 }
 0x4c3   :  { %v2139_v50 = vpop.eup %2138 }
 0x4c4   :  { %v2141_v52 = vpop.eup %2140  ;;  %371 = vrot.lane.b32.xlu0 %v2139_v50, %s2327_s3 }
 0x4c5   :  { %391 = vrot.lane.b32.xlu1 %v2141_v52, %s2327_s3 }
 0x536   :  { %v372_v51 = vpop.permute.xlu0 %371 }
 0x537   :  { %v374_v53 = vmul.f32 %v2135_v36, %v372_v51  ;;  %v392_v54 = vpop.permute.xlu1 %391 }
 0x538   :  { %v2555_v55 = vmul.f32 %v2137_v38, %v392_v54 }
 0x539   :  { %396 = vrot.lane.b32.xlu0 %v374_v53, %s2328_s27 }
 0x53a   :  { %400 = vrot.lane.b32.xlu1 %v2555_v55, %s2327_s3 }
 0x5ab   :  { %v2560_v56 = vpop.permute.xlu0 %396 }
 0x5ac   :  { %v401_v57 = vpop.permute.xlu1 %400 }
 0x5ad   :  { %v403_v58 = vsel %vm286_vm1, %v2560_v56, %v401_v57 }
 0x5ae   :  { %v404_v59 = vpack.c.bf16 %v403_v58, %v403_v58 }
 0x5b0   :  { %v406_v62 = vrot.slane %v404_v59, 1 }
 0x5b2   :  { %1976 = vmatmul.mubr.msk.bf16.vlgmr.msra.gmra.mrb[4].mxu1 %vm181_vm2, %v406_v62 }
 0x5b3   :  { %650 = vmatpush1.bf16.msra.mxu1 %v2411_v2  ;;  %681 = vmatprep.mubr.bf16.mxu1 %v2325_v0 }
 0x5b4   :  { %651 = vmatprep.subr.bf16.mxu1 %v2417_v3 }
 0x5b7   :  { %652 = vmatpush1.bf16.msra.mxu1 %v2422_v4 }
 0x5b8   :  { %653 = vmatprep.subr.bf16.mxu1 %v2435_v7 }
 0x5bb   :  { %654 = vmatpush1.bf16.msra.mxu1 %v2444_v9 }
 0x5bc   :  { %655 = vmatprep.subr.bf16.mxu1 %v2449_v10 }
 0x5bf   :  { %656 = vmatpush1.bf16.msra.mxu1 %v2456_v11 }
 0x5c0   :  { %879 = vmatprep.subr.bf16.mxu1 %v2406_v1 }
 0x685   :  { %v444_v63 = vpop.f32.mrb[4].mxu1 }
 0x686   :  { %v453_v5 = vrot.slane %v444_v63, 4  ;;  %v446_v6 = vpop.f32.mrb[5].mxu1 }
 0x687   :  { %v454_v8 = vrot.slane %v446_v6, 4  ;;  %v448_v12 = vpop.f32.mrb[6].mxu1 }
 0x688   :  { %v457_v18 = vadd.f32 %v453_v5, %v2500_v27  ;;  %v449_v19 = vpop.f32.mrb[7].mxu1 }
 0x689   :  { %v458_v20 = vadd.f32 %v454_v8, %v138_v28 }
 0x68a   :  { %2142 = vtanh.f32 %v457_v18  ;;  %v1977_v25 = vmul.f32 -1.442695, %v457_v18 }
 0x68b   :  { %2144 = vtanh.f32 %v458_v20  ;;  %v1978_v29 = vmul.f32 -1.442695, %v458_v20 }
 0x68c   :  { %2146 = vpow2.f32 %v1977_v25 }
 0x68d   :  { %2148 = vpow2.f32 %v1978_v29 }
 0x694   :  { %v2143_v21 = vpop.eup %2142 }
 0x695   :  { %v2145_v23 = vpop.eup %2144  ;;  %478 = vrot.lane.b32.xlu0 %v2143_v21, %s2327_s3 }
 0x696   :  { %498 = vrot.lane.b32.xlu1 %v2145_v23, %s2327_s3  ;;  %v2147_v30 = vpop.eup %2146 }
 0x697   :  { %v2149_v31 = vpop.eup %2148  ;;  %v462_v32 = vadd.f32 1.0, %v2147_v30 }
 0x698   :  { %v469_v33 = vadd.f32 1.0, %v2149_v31 }
 0x699   :  { %2150 = vrcp.f32 %v462_v32 }
 0x69a   :  { %2152 = vrcp.f32 %v469_v33 }
 0x6a3   :  { %v2151_v34 = vpop.eup %2150 }
 0x6a4   :  { %v2153_v35 = vpop.eup %2152  ;;  %v476_v41 = vmul.f32 %v2151_v34, %v474_v39 }
 0x6a5   :  { %v496_v43 = vmul.f32 %v2153_v35, %v494_v40 }
 0x707   :  { %v479_v28 = vpop.permute.xlu0 %478 }
 0x708   :  { %v481_v36 = vmul.f32 %v2151_v34, %v479_v28  ;;  %v499_v37 = vpop.permute.xlu1 %498 }
 0x709   :  { %v501_v38 = vmul.f32 %v2153_v35, %v499_v37 }
 0x70a   :  { %483 = vrot.lane.b32.xlu0 %v481_v36, %s2328_s27 }
 0x70b   :  { %503 = vrot.lane.b32.xlu1 %v501_v38, %s2328_s27 }
 0x77c   :  { %v484_v42 = vpop.permute.xlu0 %483 }
 0x77d   :  { %v2583_v44 = vadd.f32 %v484_v42, %v476_v41  ;;  %v504_v45 = vpop.permute.xlu1 %503 }
 0x77e   :  { %v2585_v46 = vadd.f32 %v504_v45, %v496_v43 }
 0x77f   :  { %2154 = vtanh.f32 %v2583_v44  ;;  %v592_v28 = vrot.slane %v2583_v44, 6 }
 0x780   :  { %2156 = vtanh.f32 %v2585_v46 }
 0x789   :  { %v2155_v48 = vpop.eup %2154 }
 0x78a   :  { %v2157_v50 = vpop.eup %2156  ;;  %489 = vrot.lane.b32.xlu0 %v2155_v48, %s2327_s3 }
 0x78b   :  { %509 = vrot.lane.b32.xlu1 %v2157_v50, %s2327_s3 }
 0x7fc   :  { %v490_v47 = vpop.permute.xlu0 %489 }
 0x7fd   :  { %v492_v49 = vmul.f32 %v2151_v34, %v490_v47  ;;  %v510_v52 = vpop.permute.xlu1 %509 }
 0x7fe   :  { %v2591_v51 = vmul.f32 %v2153_v35, %v510_v52  ;;  %v612_v35 = vrot.slane %v2585_v46, 6 }
 0x7ff   :  { %514 = vrot.lane.b32.xlu0 %v492_v49, %s2328_s27 }
 0x800   :  { %518 = vrot.lane.b32.xlu1 %v2591_v51, %s2327_s3 }
 0x871   :  { %v2596_v53 = vpop.permute.xlu0 %514 }
 0x872   :  { %v519_v54 = vpop.permute.xlu1 %518 }
 0x873   :  { %v521_v57 = vsel %vm286_vm1, %v2596_v53, %v519_v54 }
 0x874   :  { %v522_v58 = vpack.c.bf16 %v521_v57, %v521_v57 }
 0x876   :  { %v524_v59 = vrot.slane %v522_v58, 2  ;;  %v632_v58 = vrot.slane %v2494_v22, 6 }
 0x878   :  { %1979 = vmatmul.mubr.msk.bf16.vlgmr.msra.gmra.mrb[8].mxu0 %vm181_vm2, %v524_v59 }
 0x879   :  { %762 = vmatpush1.bf16.msra.mxu0 %v2411_v2  ;;  %793 = vmatprep.mubr.bf16.mxu0 %v2325_v0 }
 0x87a   :  { %763 = vmatprep.subr.bf16.mxu0 %v2417_v3 }
 0x87d   :  { %764 = vmatpush1.bf16.msra.mxu0 %v2422_v4 }
 0x87e   :  { %765 = vmatprep.subr.bf16.mxu0 %v2435_v7 }
 0x881   :  { %766 = vmatpush1.bf16.msra.mxu0 %v2444_v9 }
 0x882   :  { %767 = vmatprep.subr.bf16.mxu0 %v2449_v10 }
 0x885   :  { %768 = vmatpush1.bf16.msra.mxu0 %v2456_v11 }
 0x886   :  { %997 = vmatprep.subr.bf16.mxu0 %v2406_v1 }
 0x94b   :  { %v562_v62 = vpop.f32.mrb[8].mxu0 }
 0x94c   :  { %v571_v63 = vrot.slane %v562_v62, 2  ;;  %v564_v5 = vpop.f32.mrb[9].mxu0 }
 0x94d   :  { %v572_v6 = vrot.slane %v564_v5, 2  ;;  %v566_v8 = vpop.f32.mrb[10].mxu0 }
 0x94e   :  { %v575_v12 = vadd.f32 %v571_v63, %v2500_v27  ;;  %v567_v18 = vpop.f32.mrb[11].mxu0 }
 0x94f   :  { %v576_v19 = vadd.f32 %v572_v6, %v276_v16 }
 0x950   :  { %2158 = vtanh.f32 %v575_v12  ;;  %v1980_v1 = vmul.f32 -1.442695, %v575_v12 }
 0x951   :  { %2160 = vtanh.f32 %v576_v19  ;;  %v1981_v23 = vmul.f32 -1.442695, %v576_v19 }
 0x952   :  { %2162 = vpow2.f32 %v1980_v1 }
 0x953   :  { %2164 = vpow2.f32 %v1981_v23 }
 0x95a   :  { %v2159_v20 = vpop.eup %2158 }
 0x95b   :  { %v2161_v21 = vpop.eup %2160  ;;  %596 = vrot.lane.b32.xlu0 %v2159_v20, %s2327_s3 }
 0x95c   :  { %616 = vrot.lane.b32.xlu1 %v2161_v21, %s2327_s3  ;;  %v2163_v25 = vpop.eup %2162 }
 0x95d   :  { %v2165_v29 = vpop.eup %2164  ;;  %v580_v30 = vadd.f32 1.0, %v2163_v25 }
 0x95e   :  { %v587_v27 = vadd.f32 1.0, %v2165_v29 }
 0x95f   :  { %2166 = vrcp.f32 %v580_v30 }
 0x960   :  { %2168 = vrcp.f32 %v587_v27 }
 0x969   :  { %v2167_v26 = vpop.eup %2166 }
 0x96a   :  { %v2169_v31 = vpop.eup %2168  ;;  %v594_v36 = vmul.f32 %v2167_v26, %v592_v28 }
 0x96b   :  { %v614_v38 = vmul.f32 %v2169_v31, %v612_v35 }
 0x9cd   :  { %v597_v16 = vpop.permute.xlu0 %596 }
 0x9ce   :  { %v599_v32 = vmul.f32 %v2167_v26, %v597_v16  ;;  %v617_v33 = vpop.permute.xlu1 %616 }
 0x9cf   :  { %v619_v34 = vmul.f32 %v2169_v31, %v617_v33 }
 0x9d0   :  { %601 = vrot.lane.b32.xlu0 %v599_v32, %s2328_s27 }
 0x9d1   :  { %621 = vrot.lane.b32.xlu1 %v619_v34, %s2328_s27 }
 0xa42   :  { %v602_v37 = vpop.permute.xlu0 %601 }
 0xa43   :  { %v2619_v39 = vadd.f32 %v602_v37, %v594_v36  ;;  %v622_v40 = vpop.permute.xlu1 %621 }
 0xa44   :  { %v2621_v41 = vadd.f32 %v622_v40, %v614_v38 }
 0xa45   :  { %2170 = vtanh.f32 %v2619_v39 }
 0xa46   :  { %2172 = vtanh.f32 %v2621_v41  ;;  %v727_v32 = vrot.slane %v2621_v41, 6 }
 0xa4f   :  { %v2171_v42 = vpop.eup %2170 }
 0xa50   :  { %v2173_v43 = vpop.eup %2172  ;;  %607 = vrot.lane.b32.xlu0 %v2171_v42, %s2327_s3 }
 0xa51   :  { %627 = vrot.lane.b32.xlu1 %v2173_v43, %s2327_s3 }
 0xac2   :  { %v608_v44 = vpop.permute.xlu0 %607 }
 0xac3   :  { %v610_v45 = vmul.f32 %v2167_v26, %v608_v44  ;;  %v628_v46 = vpop.permute.xlu1 %627 }
 0xac4   :  { %v2627_v48 = vmul.f32 %v2169_v31, %v628_v46  ;;  %v707_v31 = vrot.slane %v2619_v39, 6 }
 0xac5   :  { %635 = vrot.lane.b32.xlu0 %v610_v45, %s2328_s27 }
 0xac6   :  { %639 = vrot.lane.b32.xlu1 %v2627_v48, %s2327_s3 }
 0xb37   :  { %v2632_v50 = vpop.permute.xlu0 %635 }
 0xb38   :  { %v640_v47 = vpop.permute.xlu1 %639 }
 0xb39   :  { %v642_v49 = vsel %vm286_vm1, %v2632_v50, %v640_v47 }
 0xb3a   :  { %v643_v52 = vpack.c.bf16 %v642_v49, %v642_v49 }
 0xb3c   :  { %v645_v54 = vrot.slane %v643_v52, 3 }
 0xb3e   :  { %1982 = vmatmul.mubr.msk.bf16.vlgmr.msra.gmra.mrb[8].mxu1 %vm181_vm2, %v645_v54 }
 0xb3f   :  { %880 = vmatpush1.bf16.msra.mxu1 %v2411_v2  ;;  %911 = vmatprep.mubr.bf16.mxu1 %v2325_v0 }
 0xb40   :  { %881 = vmatprep.subr.bf16.mxu1 %v2417_v3 }
 0xb43   :  { %882 = vmatpush1.bf16.msra.mxu1 %v2422_v4 }
 0xb44   :  { %883 = vmatprep.subr.bf16.mxu1 %v2435_v7 }
 0xb47   :  { %884 = vmatpush1.bf16.msra.mxu1 %v2444_v9 }
 0xb48   :  { %885 = vmatprep.subr.bf16.mxu1 %v2449_v10 }
 0xb4b   :  { %886 = vmatpush1.bf16.msra.mxu1 %v2456_v11 }
 0xc11   :  { %v683_v57 = vpop.f32.mrb[8].mxu1 }
 0xc12   :  { %v690_v59 = vadd.f32 %v683_v57, %v2496_v24  ;;  %v685_v62 = vpop.f32.mrb[9].mxu1 }
 0xc13   :  { %v691_v63 = vadd.f32 %v685_v62, %v632_v58  ;;  %v687_v5 = vpop.f32.mrb[10].mxu1 }
 0xc14   :  { %2174 = vtanh.f32 %v690_v59  ;;  %v688_v6 = vpop.f32.mrb[11].mxu1  ;;  %v1983_v18 = vmul.f32 -1.442695, %v690_v59 }
 0xc15   :  { %2176 = vtanh.f32 %v691_v63  ;;  %v1984_v19 = vmul.f32 -1.442695, %v691_v63 }
 0xc16   :  { %2178 = vpow2.f32 %v1983_v18 }
 0xc17   :  { %2180 = vpow2.f32 %v1984_v19 }
 0xc1e   :  { %v2175_v8 = vpop.eup %2174 }
 0xc1f   :  { %v2177_v12 = vpop.eup %2176  ;;  %711 = vrot.lane.b32.xlu0 %v2175_v8, %s2327_s3 }
 0xc20   :  { %731 = vrot.lane.b32.xlu1 %v2177_v12, %s2327_s3  ;;  %v2179_v20 = vpop.eup %2178 }
 0xc21   :  { %v2181_v21 = vpop.eup %2180  ;;  %v695_v1 = vadd.f32 1.0, %v2179_v20 }
 0xc22   :  { %v702_v23 = vadd.f32 1.0, %v2181_v21 }
 0xc23   :  { %2182 = vrcp.f32 %v695_v1 }
 0xc24   :  { %2184 = vrcp.f32 %v702_v23 }
 0xc2d   :  { %v2183_v25 = vpop.eup %2182 }
 0xc2e   :  { %v2185_v30 = vpop.eup %2184  ;;  %v709_v33 = vmul.f32 %v2183_v25, %v707_v31 }
 0xc2f   :  { %v729_v28 = vmul.f32 %v2185_v30, %v727_v32 }
 0xc91   :  { %v712_v29 = vpop.permute.xlu0 %711 }
 0xc92   :  { %v714_v27 = vmul.f32 %v2183_v25, %v712_v29  ;;  %v732_v26 = vpop.permute.xlu1 %731 }
 0xc93   :  { %v734_v16 = vmul.f32 %v2185_v30, %v732_v26 }
 0xc94   :  { %716 = vrot.lane.b32.xlu0 %v714_v27, %s2328_s27 }
 0xc95   :  { %736 = vrot.lane.b32.xlu1 %v734_v16, %s2328_s27 }
 0xd06   :  { %v717_v34 = vpop.permute.xlu0 %716 }
 0xd07   :  { %v2655_v35 = vadd.f32 %v717_v34, %v709_v33  ;;  %v737_v36 = vpop.permute.xlu1 %736 }
 0xd08   :  { %v2657_v37 = vadd.f32 %v737_v36, %v729_v28 }
 0xd09   :  { %2186 = vtanh.f32 %v2655_v35  ;;  %v825_v23 = vrot.slane %v2655_v35, 6 }
 0xd0a   :  { %2188 = vtanh.f32 %v2657_v37 }
 0xd13   :  { %v2187_v38 = vpop.eup %2186 }
 0xd14   :  { %v2189_v40 = vpop.eup %2188  ;;  %722 = vrot.lane.b32.xlu0 %v2187_v38, %s2327_s3 }
 0xd15   :  { %742 = vrot.lane.b32.xlu1 %v2189_v40, %s2327_s3 }
 0xd86   :  { %v723_v39 = vpop.permute.xlu0 %722 }
 0xd87   :  { %v725_v41 = vmul.f32 %v2183_v25, %v723_v39  ;;  %v743_v42 = vpop.permute.xlu1 %742  ;;  %v845_v25 = vrot.slane %v2657_v37, 6 }
 0xd88   :  { %v2663_v43 = vmul.f32 %v2185_v30, %v743_v42 }
 0xd89   :  { %749 = vrot.lane.b32.xlu0 %v725_v41, %s2328_s27 }
 0xd8a   :  { %753 = vrot.lane.b32.xlu1 %v2663_v43, %s2327_s3 }
 0xdfb   :  { %v2668_v44 = vpop.permute.xlu0 %749 }
 0xdfc   :  { %v754_v45 = vpop.permute.xlu1 %753 }
 0xdfd   :  { %v756_v46 = vsel %vm286_vm1, %v2668_v44, %v754_v45 }
 0xdfe   :  { %v757_v47 = vpack.c.bf16 %v756_v46, %v756_v46 }
 0xe00   :  { %1985 = vmatmul.mubr.msk.bf16.vlgmr.msra.gmra.mrb[12].mxu0 %vm181_vm2, %v757_v47 }
 0xe01   :  { %998 = vmatpush1.bf16.msra.mxu0 %v2411_v2  ;;  %1029 = vmatprep.mubr.bf16.mxu0 %v2325_v0  ;;  %v746_v2 = vrot.slane %v2494_v22, 2 }
 0xe02   :  { %999 = vmatprep.subr.bf16.mxu0 %v2417_v3 }
 0xe05   :  { %1000 = vmatpush1.bf16.msra.mxu0 %v2422_v4 }
 0xe06   :  { %1001 = vmatprep.subr.bf16.mxu0 %v2435_v7 }
 0xe09   :  { %1002 = vmatpush1.bf16.msra.mxu0 %v2444_v9 }
 0xe0a   :  { %1003 = vmatprep.subr.bf16.mxu0 %v2449_v10 }
 0xe0d   :  { %1004 = vmatpush1.bf16.msra.mxu0 %v2456_v11 }
 0xe0e   :  { %1877 = vmatprep.subr.bf16.mxu0 %v2325_v0 }
 0xed3   :  { %v795_v49 = vpop.f32.mrb[12].mxu0 }
 0xed4   :  { %v804_v52 = vrot.slane %v795_v49, 6  ;;  %v797_v54 = vpop.f32.mrb[13].mxu0 }
 0xed5   :  { %v805_v57 = vrot.slane %v797_v54, 6  ;;  %v799_v59 = vpop.f32.mrb[14].mxu0 }
 0xed6   :  { %v808_v3 = vadd.f32 %v804_v52, %v2496_v24  ;;  %v800_v4 = vpop.f32.mrb[15].mxu0 }
 0xed7   :  { %v809_v7 = vadd.f32 %v805_v57, %v746_v2 }
 0xed8   :  { %2190 = vtanh.f32 %v808_v3  ;;  %v1986_v11 = vmul.f32 -1.442695, %v808_v3 }
 0xed9   :  { %2192 = vtanh.f32 %v809_v7  ;;  %v1987_v62 = vmul.f32 -1.442695, %v809_v7 }
 0xeda   :  { %2194 = vpow2.f32 %v1986_v11 }
 0xedb   :  { %2196 = vpow2.f32 %v1987_v62 }
 0xee2   :  { %v2191_v9 = vpop.eup %2190 }
 0xee3   :  { %v2193_v10 = vpop.eup %2192  ;;  %829 = vrot.lane.b32.xlu0 %v2191_v9, %s2327_s3 }
 0xee4   :  { %849 = vrot.lane.b32.xlu1 %v2193_v10, %s2327_s3  ;;  %v2195_v63 = vpop.eup %2194 }
 0xee5   :  { %v2197_v5 = vpop.eup %2196  ;;  %v813_v6 = vadd.f32 1.0, %v2195_v63 }
 0xee6   :  { %v820_v8 = vadd.f32 1.0, %v2197_v5 }
 0xee7   :  { %2198 = vrcp.f32 %v813_v6 }
 0xee8   :  { %2200 = vrcp.f32 %v820_v8 }
 0xef1   :  { %v2199_v12 = vpop.eup %2198 }
 0xef2   :  { %v2201_v19 = vpop.eup %2200  ;;  %v827_v29 = vmul.f32 %v2199_v12, %v825_v23 }
 0xef3   :  { %v847_v27 = vmul.f32 %v2201_v19, %v845_v25 }
 0xf55   :  { %v830_v18 = vpop.permute.xlu0 %829 }
 0xf56   :  { %v832_v20 = vmul.f32 %v2199_v12, %v830_v18  ;;  %v850_v21 = vpop.permute.xlu1 %849 }
 0xf57   :  { %v852_v1 = vmul.f32 %v2201_v19, %v850_v21 }
 0xf58   :  { %834 = vrot.lane.b32.xlu0 %v832_v20, %s2328_s27 }
 0xf59   :  { %854 = vrot.lane.b32.xlu1 %v852_v1, %s2328_s27 }
 0xfca   :  { %v835_v30 = vpop.permute.xlu0 %834 }
 0xfcb   :  { %v837_v26 = vadd.f32 %v835_v30, %v827_v29  ;;  %v855_v16 = vpop.permute.xlu1 %854 }
 0xfcc   :  { %v857_v31 = vadd.f32 %v855_v16, %v847_v27 }
 0xfcd   :  { %2202 = vtanh.f32 %v837_v26  ;;  %v943_v18 = vrot.slane %v837_v26, 6 }
 0xfce   :  { %2204 = vtanh.f32 %v857_v31 }
 0xfd7   :  { %v2203_v32 = vpop.eup %2202 }
 0xfd8   :  { %v2205_v33 = vpop.eup %2204  ;;  %840 = vrot.lane.b32.xlu0 %v2203_v32, %s2327_s3 }
 0xfd9   :  { %860 = vrot.lane.b32.xlu1 %v2205_v33, %s2327_s3 }
0x104a   :  { %v841_v34 = vpop.permute.xlu0 %840 }
0x104b   :  { %v843_v28 = vmul.f32 %v2199_v12, %v841_v34  ;;  %v861_v36 = vpop.permute.xlu1 %860 }
0x104c   :  { %v2694_v35 = vmul.f32 %v2201_v19, %v861_v36  ;;  %v963_v19 = vrot.slane %v857_v31, 6 }
0x104d   :  { %865 = vrot.lane.b32.xlu0 %v843_v28, %s2328_s27 }
0x104e   :  { %869 = vrot.lane.b32.xlu1 %v2694_v35, %s2327_s3 }
0x10bf   :  { %v2699_v37 = vpop.permute.xlu0 %865 }
0x10c0   :  { %v870_v38 = vpop.permute.xlu1 %869 }
0x10c1   :  { %v872_v40 = vsel %vm286_vm1, %v2699_v37, %v870_v38 }
0x10c2   :  { %v873_v39 = vpack.c.bf16 %v872_v40, %v872_v40 }
0x10c4   :  { %v875_v41 = vrot.slane %v873_v39, 1 }
0x10c6   :  { %1988 = vmatmul.mubr.msk.bf16.vlgmr.msra.gmra.mrb[12].mxu1 %vm181_vm2, %v875_v41 }
0x1199   :  { %v913_v42 = vpop.f32.mrb[12].mxu1 }
0x119a   :  { %v922_v45 = vrot.slane %v913_v42, 4  ;;  %v915_v46 = vpop.f32.mrb[13].mxu1 }
0x119b   :  { %v923_v47 = vrot.slane %v915_v46, 4  ;;  %v917_v49 = vpop.f32.mrb[14].mxu1 }
0x119c   :  { %v926_v52 = vadd.f32 %v922_v45, %v2496_v24  ;;  %v918_v54 = vpop.f32.mrb[15].mxu1 }
0x119d   :  { %v927_v57 = vadd.f32 %v923_v47, %v632_v58 }
0x119e   :  { %2206 = vtanh.f32 %v926_v52  ;;  %v1989_v4 = vmul.f32 -1.442695, %v926_v52 }
0x119f   :  { %2208 = vtanh.f32 %v927_v57  ;;  %v1990_v7 = vmul.f32 -1.442695, %v927_v57 }
0x11a0   :  { %2210 = vpow2.f32 %v1989_v4 }
0x11a1   :  { %2212 = vpow2.f32 %v1990_v7 }
0x11a8   :  { %v2207_v59 = vpop.eup %2206 }
0x11a9   :  { %v2209_v3 = vpop.eup %2208  ;;  %947 = vrot.lane.b32.xlu0 %v2207_v59, %s2327_s3 }
0x11aa   :  { %967 = vrot.lane.b32.xlu1 %v2209_v3, %s2327_s3  ;;  %v2211_v9 = vpop.eup %2210 }
0x11ab   :  { %v2213_v10 = vpop.eup %2212  ;;  %v931_v11 = vadd.f32 1.0, %v2211_v9 }
0x11ac   :  { %v938_v62 = vadd.f32 1.0, %v2213_v10 }
0x11ad   :  { %2214 = vrcp.f32 %v931_v11 }
0x11ae   :  { %2216 = vrcp.f32 %v938_v62 }
0x11b7   :  { %v2215_v63 = vpop.eup %2214 }
0x11b8   :  { %v2217_v5 = vpop.eup %2216  ;;  %v945_v20 = vmul.f32 %v2215_v63, %v943_v18 }
0x11b9   :  { %v965_v1 = vmul.f32 %v2217_v5, %v963_v19 }
0x121b   :  { %v948_v58 = vpop.permute.xlu0 %947 }
0x121c   :  { %v950_v6 = vmul.f32 %v2215_v63, %v948_v58  ;;  %v968_v8 = vpop.permute.xlu1 %967 }
0x121d   :  { %v970_v12 = vmul.f32 %v2217_v5, %v968_v8 }
0x121e   :  { %952 = vrot.lane.b32.xlu0 %v950_v6, %s2328_s27 }
0x121f   :  { %972 = vrot.lane.b32.xlu1 %v970_v12, %s2328_s27 }
0x1290   :  { %v953_v21 = vpop.permute.xlu0 %952 }
0x1291   :  { %v955_v23 = vadd.f32 %v953_v21, %v945_v20  ;;  %v973_v25 = vpop.permute.xlu1 %972 }
0x1292   :  { %v975_v29 = vadd.f32 %v973_v25, %v965_v1  ;;  %v1116_v1 = vrot.slane %v2663_v43, 2 }
0x1293   :  { %2218 = vtanh.f32 %v955_v23 }
0x1294   :  { %2220 = vtanh.f32 %v975_v29  ;;  %v1081_v58 = vrot.slane %v975_v29, 6  ;;  %v1126_v29 = vrot.slane %v2591_v51, 2  ;;  %v1121_v51 = vrot.slane %v2627_v48, 6 }
0x129d   :  { %v2219_v30 = vpop.eup %2218 }
0x129e   :  { %v2221_v27 = vpop.eup %2220  ;;  %958 = vrot.lane.b32.xlu0 %v2219_v30, %s2327_s3  ;;  %v1140_v30 = vrot.slane %v2519_v60, 2 }
0x129f   :  { %978 = vrot.lane.b32.xlu1 %v2221_v27, %s2327_s3  ;;  %v1131_v27 = vrot.slane %v2555_v55, 6 }
0x1310   :  { %v959_v16 = vpop.permute.xlu0 %958 }
0x1311   :  { %v961_v32 = vmul.f32 %v2215_v63, %v959_v16  ;;  %v979_v33 = vpop.permute.xlu1 %978  ;;  %v1061_v63 = vrot.slane %v955_v23, 6  ;;  %v1111_v23 = vrot.slane %v2694_v35, 6 }
0x1312   :  { %v981_v34 = vmul.f32 %v2217_v5, %v979_v33 }
0x1313   :  { %983 = vrot.lane.b32.xlu0 %v961_v32, %s2328_s27 }
0x1314   :  { %987 = vrot.lane.b32.xlu1 %v981_v34, %s2327_s3  ;;  %v1106_v25 = vrot.slane %v981_v34, 2 }
0x1385   :  { %v2715_v26 = vpop.permute.xlu0 %983 }
0x1386   :  { %v988_v31 = vpop.permute.xlu1 %987 }
0x1387   :  { %v990_v28 = vsel %vm286_vm1, %v2715_v26, %v988_v31  ;;  %v2329_v31 = vmov 1966171168  }
0x1388   :  { %v991_v36 = vpack.c.bf16 %v990_v28, %v990_v28  ;;  %v1147_v28 = vunpack.c.l.s4 %v2329_v31 }
0x138a   :  { %v993_v38 = vrot.slane %v991_v36, 2  ;;  %v1148_v55 = vunpack.c.0.s8 %v1147_v28 }
0x138c   :  { %1991 = vmatmul.mubr.msk.bf16.vlgmr.msra.gmra.mrb[16].mxu0 %vm181_vm2, %v993_v38 }
0x145f   :  { %v1031_v40 = vpop.f32.mrb[16].mxu0 }
0x1460   :  { %v1040_v39 = vrot.slane %v1031_v40, 2  ;;  %v1033_v41 = vpop.f32.mrb[17].mxu0  ;;  %v2745_v40 = vsub.s32 %v1148_v55, %v2481_v14 }
0x1461   :  { %v1041_v42 = vrot.slane %v1033_v41, 2  ;;  %v1035_v45 = vpop.f32.mrb[18].mxu0 }
0x1462   :  { %v1044_v46 = vadd.f32 %v1040_v39, %v2496_v24  ;;  %v1036_v47 = vpop.f32.mrb[19].mxu0 }
0x1463   :  { %v1045_v49 = vadd.f32 %v1041_v42, %v746_v2 }
0x1464   :  { %2222 = vtanh.f32 %v1044_v46  ;;  %v1992_v57 = vmul.f32 -1.442695, %v1044_v46 }
0x1465   :  { %2224 = vtanh.f32 %v1045_v49  ;;  %v1993_v59 = vmul.f32 -1.442695, %v1045_v49 }
0x1466   :  { %2226 = vpow2.f32 %v1992_v57 }
0x1467   :  { %2228 = vpow2.f32 %v1993_v59 }
0x146e   :  { %v2223_v52 = vpop.eup %2222 }
0x146f   :  { %v2225_v54 = vpop.eup %2224  ;;  %1065 = vrot.lane.b32.xlu1 %v2223_v52, %s2327_s3 }
0x1470   :  { %1085 = vrot.lane.b32.xlu0 %v2225_v54, %s2327_s3  ;;  %v2227_v3 = vpop.eup %2226 }
0x1471   :  { %v2229_v4 = vpop.eup %2228  ;;  %v1049_v7 = vadd.f32 1.0, %v2227_v3 }
0x1472   :  { %v1056_v24 = vadd.f32 1.0, %v2229_v4 }
0x1473   :  { %2230 = vrcp.f32 %v1049_v7 }
0x1474   :  { %2232 = vrcp.f32 %v1056_v24 }
0x147d   :  { %v2231_v22 = vpop.eup %2230 }
0x147e   :  { %v2233_v9 = vpop.eup %2232  ;;  %v1063_v5 = vmul.f32 %v2231_v22, %v1061_v63 }
0x147f   :  { %v1083_v8 = vmul.f32 %v2233_v9, %v1081_v58 }
0x14e1   :  { %v1066_v2 = vpop.permute.xlu1 %1065 }
0x14e2   :  { %v1068_v10 = vmul.f32 %v2231_v22, %v1066_v2  ;;  %v1086_v11 = vpop.permute.xlu0 %1085 }
0x14e3   :  { %v1088_v62 = vmul.f32 %v2233_v9, %v1086_v11 }
0x14e4   :  { %1070 = vrot.lane.b32.xlu1 %v1068_v10, %s2328_s27 }
0x14e5   :  { %1090 = vrot.lane.b32.xlu0 %v1088_v62, %s2328_s27 }
0x1556   :  { %v1071_v6 = vpop.permute.xlu1 %1070 }
0x1557   :  { %v1073_v12 = vadd.f32 %v1071_v6, %v1063_v5  ;;  %v1091_v18 = vpop.permute.xlu0 %1090 }
0x1558   :  { %v1093_v19 = vadd.f32 %v1091_v18, %v1083_v8 }
0x1559   :  { %2234 = vtanh.f32 %v1073_v12 }
0x155a   :  { %2236 = vtanh.f32 %v1093_v19 }
0x1563   :  { %v2235_v20 = vpop.eup %2234 }
0x1564   :  { %v2237_v21 = vpop.eup %2236  ;;  %1076 = vrot.lane.b32.xlu1 %v2235_v20, %s2327_s3 }
0x1565   :  { %1096 = vrot.lane.b32.xlu0 %v2237_v21, %s2327_s3 }
0x1568   :  { %1117 = vrot.lane.b32.xlu1 %v1116_v1, %s2327_s3 }
0x1569   :  { %1107 = vrot.lane.b32.xlu0 %v1106_v25, %s2327_s3 }
0x156d   :  { %1112 = vrot.lane.b32.xlu0 %v1111_v23, %s2327_s3 }
0x1571   :  { %1127 = vrot.lane.b32.xlu0 %v1126_v29, %s2327_s3 }
0x1575   :  { %1141 = vrot.lane.b32.xlu0 %v1140_v30, %s2327_s3 }
0x1579   :  { %1132 = vrot.lane.b32.xlu0 %v1131_v27, %s2327_s3 }
0x15d6   :  { %v1077_v43 = vpop.permute.xlu1 %1076 }
0x15d7   :  { %v1079_v16 = vmul.f32 %v2231_v22, %v1077_v43  ;;  %v1097_v32 = vpop.permute.xlu0 %1096 }
0x15d8   :  { %v1099_v33 = vmul.f32 %v2233_v9, %v1097_v32 }
0x15d9   :  { %1137 = vrot.lane.b32.xlu1 %v1079_v16, %s2328_s27 }
0x15da   :  { %v1101_v35 = vrot.slane %v1099_v33, 6  ;;  %v1118_v38 = vpop.permute.xlu1 %1117 }
0x15db   :  { %v1108_v60 = vpop.permute.xlu0 %1107  ;;  %v1120_v41 = vsel %vm286_vm1, %v2632_v50, %v1118_v38 }
0x15dc   :  { %v1110_v39 = vsel %vm286_vm1, %v2560_v56, %v1108_v60  ;;  %v1220_v46 = vcombine.high %v1120_v41, %v1120_v41 }
0x15dd   :  { %1102 = vrot.lane.b32.xlu1 %v1101_v35, %s2327_s3  ;;  %v1177_v45 = vrot.slane %v1110_v39, %v2745_v40 }
0x15de   :  { %v1227_v54 = vrot.slane %v1220_v46, %v2745_v40 }
0x15df   :  { %v1113_v34 = vpop.permute.xlu0 %1112  ;;  %v1178_v49 = vcombine.high %v1177_v45, %v1177_v45  ;;  %v1185_v57 = vrot.slane %v1177_v45, %v2745_v40 }
0x15e0   :  { %v1115_v48 = vsel %vm286_vm1, %v2596_v53, %v1113_v34  ;;  %v1228_v7 = vcombine.high %v1227_v54, %v1227_v54  ;;  %v1235_v62 = vrot.slane %v1227_v54, %v2745_v40 }
0x15e1   :  { %1122 = vrot.lane.b32.xlu1 %v1121_v51, %s2327_s3  ;;  %v1196_v47 = vcombine.high %v1115_v48, %v1115_v48  ;;  %v1192_v53 = vrot.slane %v1178_v49, %v2745_v40  ;;  %v1193_v2 = vcombine.high %v1185_v57, %v1185_v57 }
0x15e2   :  { %v1242_v58 = vrot.slane %v1228_v7, %v2745_v40  ;;  %v1243_v23 = vcombine.high %v1235_v62, %v1235_v62  ;;  %v1994_v7 = vld [vmem:[%s2946_s4] ss:$0 sm:$0xff] }
0x15e3   :  { %v1128_v36 = vpop.permute.xlu0 %1127  ;;  %v1203_v59 = vrot.slane %v1196_v47, %v2745_v40  ;;  %v1346_v8 = vrot.slane %v1193_v2, %v2490_v17 }
0x15e4   :  { %v1130_v56 = vsel %vm286_vm1, %v2699_v37, %v1128_v36  ;;  %v1244_v33 = vcombine.high %v1242_v58, %v1242_v58  ;;  %v1366_v41 = vrot.slane %v1243_v23, %v2490_v17 }
0x15e5   :  { %v1275_v24 = vrot.slane %v1130_v56, %v2745_v40  ;;  %v1204_v9 = vcombine.high %v1203_v59, %v1203_v59  ;;  %v1211_v12 = vrot.slane %v1203_v59, %v2745_v40 }
0x15e7   :  { %v1142_v42 = vpop.permute.xlu0 %1141  ;;  %v1276_v5 = vcombine.high %v1275_v24, %v1275_v24  ;;  %v1218_v18 = vrot.slane %v1204_v9, %v2745_v40  ;;  %v1283_v20 = vrot.slane %v1275_v24, %v2745_v40  ;;  %v1356_v35 = vrot.slane %v1211_v12, %v2490_v17 }
0x15e9   :  { %v1290_v27 = vrot.slane %v1276_v5, %v2745_v40  ;;  %v1360_v34 = vrot.slane %v1218_v18, %v2490_v17  ;;  %v1291_v31 = vcombine.high %v1283_v20, %v1283_v20 }
0x15eb   :  { %v1133_v52 = vpop.permute.xlu0 %1132  ;;  %v1386_v54 = vrot.slane %v1291_v31, %v2490_v17 }
0x15ec   :  { %v1135_v50 = vsel %vm286_vm1, %v2715_v26, %v1133_v52  ;;  %v1194_v26 = vcombine.high %v1192_v53, %v1192_v53  ;;  %v1370_v52 = vrot.slane %v1244_v33, %v2490_v17 }
0x15ed   :  { %v1294_v10 = vcombine.high %v1135_v50, %v1135_v50 }
0x15ee   :  { %v1350_v29 = vrot.slane %v1194_v26, %v2490_v17 }
0x15ef   :  { %v1301_v19 = vrot.slane %v1294_v10, %v2745_v40 }
0x15f1   :  { %v1302_v51 = vcombine.high %v1301_v19, %v1301_v19  ;;  %v1309_v55 = vrot.slane %v1301_v19, %v2745_v40 }
0x15f3   :  { %v1316_v45 = vrot.slane %v1302_v51, %v2745_v40  ;;  %v1396_v56 = vrot.slane %v1309_v55, %v2490_v17  ;;  %v1458_v55 = vand.u32 127, %v57_v13  ;;  %v2065_v13 = vld [vmem:[#allocation2 + $0x10] ss:$8 sps:$4 sm:$0xff]  }
0x164b   :  { %v1138_v3 = vpop.permute.xlu1 %1137 }
0x164c   :  { %v1144_v4 = vsel %vm286_vm1, %v1138_v3, %v1142_v42  ;;  %v1292_v42 = vcombine.high %v1290_v27, %v1290_v27 }
0x164d   :  { %v1318_v22 = vcombine.high %v1144_v4, %v1144_v4 }
0x164e   :  { %v1390_v53 = vrot.slane %v1292_v42, %v2490_v17 }
0x164f   :  { %v1325_v11 = vrot.slane %v1318_v22, %v2745_v40  ;;  %v1103_v37 = vpop.permute.xlu1 %1102  ;;  %v1400_v22 = vrot.slane %v1316_v45, %v2490_v17 }
0x1650   :  { %v1105_v63 = vsel %vm286_vm1, %v2523_v61, %v1103_v37 }
0x1651   :  { %v1152_v6 = vrot.slane %v1105_v63, %v2745_v40  ;;  %v1326_v21 = vcombine.high %v1325_v11, %v1325_v11  ;;  %v1333_v43 = vrot.slane %v1325_v11, %v2745_v40 }
0x1653   :  { %v1153_v1 = vcombine.high %v1152_v6, %v1152_v6  ;;  %v1160_v61 = vrot.slane %v1152_v6, %v2745_v40  ;;  %v1123_v25 = vpop.permute.xlu1 %1122  ;;  %v1341_v48 = vcombine.high %v1333_v43, %v1333_v43 }
0x1654   :  { %v1125_v30 = vsel %vm286_vm1, %v2668_v44, %v1123_v25  ;;  %v1340_v44 = vrot.slane %v1326_v21, %v2745_v40 }
0x1655   :  { %v1167_v16 = vrot.slane %v1153_v1, %v2745_v40  ;;  %v1414_v32 = vsel %vm1413_vm3, %v1160_v61, %v1346_v8  ;;  %v1252_v60 = vrot.slane %v1125_v30, %v2745_v40 }
0x1656   :  { %v1417_v36 = vsel %vm1416_vm4, %v1414_v32, %v1356_v35  ;;  %v1342_v57 = vcombine.high %v1340_v44, %v1340_v44 }
0x1657   :  { %v1415_v28 = vsel %vm1413_vm3, %v1167_v16, %v1350_v29  ;;  %v1253_v38 = vcombine.high %v1252_v60, %v1252_v60  ;;  %v1260_v39 = vrot.slane %v1252_v60, %v2745_v40  ;;  %v1420_v59 = vsel %vm1419_vm5, %v1417_v36, %v1366_v41 }
0x1658   :  { %v1418_v46 = vsel %vm1416_vm4, %v1415_v28, %v1360_v34  ;;  %v1410_v10 = vrot.slane %v1342_v57, %v2490_v17  ;;  %v2837_v36 = vsub.s32 %v1458_v55, %v2481_v14  ;;  %v2070_v14 = vld [vmem:[#allocation2 + $0x24] ss:$8 sps:$4 sm:$0xff]   ;;  %v2071_v57 = vld [vmem:[#allocation2 + $0x30] ss:$8 sps:$4 sm:$0xff]  }
0x1659   :  { %v1267_v47 = vrot.slane %v1253_v38, %v2745_v40  ;;  %v1376_v49 = vrot.slane %v1260_v39, %v2490_v17  ;;  %v1406_v40 = vrot.slane %v1341_v48, %v2490_v17  ;;  %v1421_v24 = vsel %vm1419_vm5, %v1418_v46, %v1370_v52  ;;  %v2062_v46 = vld [vmem:[#allocation2] ss:$8 sps:$4 sm:$0xff]   ;;  %v2100_v55 = vld [vmem:[%s2949_s7 + $0x10] sm:$0xff]  }
0x165a   :  { %v2068_v52 = vld [vmem:[#allocation2 + $0x20] ss:$8 sps:$4 sm:$0xff]  }
0x165b   :  { %v1380_v50 = vrot.slane %v1267_v47, %v2490_v17  ;;  %v1423_v3 = vsel %vm1422_vm6, %v1420_v59, %v1376_v49  ;;  %v2064_v47 = vld [vmem:[#allocation2 + $0x4] ss:$8 sps:$4 sm:$0xff]   ;;  %v2067_v49 = vld [vmem:[#allocation2 + $0x14] ss:$8 sps:$4 sm:$0xff]  }
0x165c   :  { %v1426_v4 = vsel %vm1425_vm7, %v1423_v3, %v1386_v54  ;;  %1724 = vmatprep.subr.bf16.mxu1 %v2064_v47  ;;  %v2073_v54 = vld [vmem:[#allocation2 + $0x34] ss:$8 sps:$4 sm:$0xff]   ;;  %v2076_v59 = vld [vmem:[#allocation2 + $0x44] ss:$8 sps:$4 sm:$0xff]   ;;  %v2077_v3 = vld [vmem:[#allocation2 + $0x50] ss:$8 sps:$4 sm:$0xff]  }
0x165d   :  { %v1429_v2 = vsel %vm1428_vm8, %v1426_v4, %v1396_v56  ;;  %v1424_v9 = vsel %vm1422_vm6, %v1421_v24, %v1380_v50  ;;  %1725 = vmatpush1.bf16.msra.mxu1 %v2062_v46  ;;  %v2074_v56 = vld [vmem:[#allocation2 + $0x40] ss:$8 sps:$4 sm:$0xff]   ;;  %v2079_v50 = vld [vmem:[#allocation2 + $0x54] ss:$8 sps:$4 sm:$0xff]  }
0x165e   :  { %v2814_v11 = vsel %vm1431_vm9, %v1429_v2, %v1406_v40  ;;  %v1427_v37 = vsel %vm1425_vm7, %v1424_v9, %v1390_v53  ;;  %1726 = vmatprep.subr.bf16.mxu1 %v2067_v49  ;;  %v2082_v53 = vld [vmem:[#allocation2 + $0x64] ss:$8 sps:$4 sm:$0xff]   ;;  %v2080_v40 = vld [vmem:[#allocation2 + $0x60] ss:$8 sps:$4 sm:$0xff]   ;;  %v2085_v4 = vld [vmem:[#allocation2 + $0x74] ss:$8 sps:$4 sm:$0xff]  }
0x165f   :  { %v1441_v62 = vmul.f32 %v1994_v7, %v2814_v11  ;;  %v1517_v26 = vsel %vm181_vm2, %v2814_v11, 0.0  ;;  %v1430_v63 = vsel %vm1428_vm8, %v1427_v37, %v1400_v22  ;;  %v1534_v22 = vsel %vm181_vm2, %v2814_v11, -inf }
0x1660   :  { %v1518_v58 = vrot.slane %v1517_v26, 4  ;;  %v2822_v5 = vsel %vm1431_vm9, %v1430_v63, %v1410_v10  ;;  %v1535_v9 = vrot.slane %v1534_v22, 4 }
0x1661   :  { %v1443_v6 = vsel %vm181_vm2, %v1441_v62, 0.0  ;;  %v1442_v8 = vmul.f32 %v1994_v7, %v2822_v5  ;;  %v1524_v12 = vsel %vm181_vm2, %v2822_v5, 0.0  ;;  %1727 = vmatpush1.bf16.msra.mxu1 %v2065_v13  ;;  %v2083_v7 = vld [vmem:[#allocation2 + $0x70] ss:$8 sps:$4 sm:$0xff]   ;;  %v1541_v24 = vsel %vm181_vm2, %v2822_v5, -inf }
0x1662   :  { %v1519_v18 = vadd.f32 %v1518_v58, %v1517_v26  ;;  %1444 = vadd.xlane.f32.xlu1 %v1443_v6  ;;  %v1525_v19 = vrot.slane %v1524_v12, 4  ;;  %1728 = vmatprep.subr.bf16.mxu1 %v2070_v14  ;;  %v1542_v2 = vrot.slane %v1541_v24, 4  ;;  %v1536_v63 = vmax.f32 %v1534_v22, %v1535_v9 }
0x1663   :  { %v1446_v20 = vsel %vm181_vm2, %v1442_v8, 0.0 }
0x1664   :  { %v1520_v21 = vrot.slane %v1519_v18, 2  ;;  %v1526_v1 = vadd.f32 %v1525_v19, %v1524_v12  ;;  %1447 = vadd.xlane.f32.xlu0 %v1446_v20  ;;  %v1543_v26 = vmax.f32 %v1541_v24, %v1542_v2  ;;  %v1537_v6 = vrot.slane %v1536_v63, 2 }
0x1665   :  { %1729 = vmatpush1.bf16.msra.mxu1 %v2068_v52 }
0x1666   :  { %v1521_v61 = vadd.f32 %v1520_v21, %v1519_v18  ;;  %v1527_v25 = vrot.slane %v1526_v1, 2  ;;  %1730 = vmatprep.subr.bf16.mxu1 %v2073_v54  ;;  %v1544_v58 = vrot.slane %v1543_v26, 2  ;;  %v1538_v12 = vmax.f32 %v1536_v63, %v1537_v6  ;;  %v2109_v63 = vld [vmem:[%s2949_s7 + $0x58] sm:$0xff]  }
0x1668   :  { %v1528_v23 = vadd.f32 %v1527_v25, %v1526_v1  ;;  %v1522_v29 = vrot.slane %v1521_v61, 1  ;;  %v1545_v8 = vmax.f32 %v1543_v26, %v1544_v58  ;;  %v2108_v26 = vld [vmem:[%s2949_s7 + $0x50] sm:$0xff]   ;;  %v1589_v58 = vld [vmem:[%s2948_s6] sm:$0x3]  ;;  %s2330_s6 = smov [#allocation6]  }
0x1669   :  { %1731 = vmatpush1.bf16.msra.mxu1 %v2071_v57  ;;  %v1594_v6 = vrot.slane %v1589_v58, %v2490_v17 }
0x166a   :  { %v1523_v30 = vadd.f32 %v1522_v29, %v1521_v61  ;;  %v1529_v27 = vrot.slane %v1528_v23, 1  ;;  %1732 = vmatprep.subr.bf16.mxu1 %v2076_v59  ;;  %v1546_v19 = vrot.slane %v1545_v8, 1  ;;  %v1539_v61 = vrot.slane %v1538_v12, 1 }
0x166c   :  { %v1530_v43 = vadd.f32 %v1529_v27, %v1528_v23  ;;  %v1532_v16 = vmul.f32 0.125, %v1523_v30  ;;  %v1547_v29 = vmax.f32 %v1545_v8, %v1546_v19  ;;  %v1540_v30 = vmax.f32 %v1538_v12, %v1539_v61  ;;  %v2088_v27 = vld [vmem:[#allocation2 + $0x84] ss:$8 sps:$4 sm:$0xff]  }
0x166d   :  { %1733 = vmatpush1.bf16.msra.mxu1 %v2074_v56  ;;  %v1598_v8 = vrot.slane %v1589_v58, %v2484_v15 }
0x166e   :  { %v1533_v32 = vmul.f32 0.125, %v1530_v43  ;;  %1734 = vmatprep.subr.bf16.mxu1 %v2079_v50  ;;  %v1554_v43 = vsel %vm1467_vm10, %v1547_v29, %v1540_v30 }
0x1670   :  { %v2830_v33 = vsel %vm1467_vm10, %v1533_v32, %v1532_v16  ;;  %v2086_v16 = vld [vmem:[#allocation2 + $0x80] ss:$8 sps:$4 sm:$0xff]   ;;  %v2091_v32 = vld [vmem:[#allocation2 + $0x94] ss:$8 sps:$4 sm:$0xff]  }
0x1671   :  { %v1564_v35 = vpack.c.bf16 %v2830_v33, %v2830_v33  ;;  %1735 = vmatpush1.bf16.msra.mxu1 %v2077_v3 }
0x1672   :  { %1736 = vmatprep.subr.bf16.mxu1 %v2082_v53 }
0x1673   :  { %2019 = vmatprep.mubr.msk.bf16.mxu1 %vm181_vm2, %v1564_v35  ;;  %v2089_v35 = vld [vmem:[#allocation2 + $0x90] ss:$8 sps:$4 sm:$0xff]  }
0x1675   :  { %1737 = vmatpush1.bf16.msra.mxu1 %v2080_v40 }
0x1676   :  { %1738 = vmatprep.subr.bf16.mxu1 %v2085_v4 }
0x1679   :  { %1739 = vmatpush1.bf16.msra.mxu1 %v2083_v7 }
0x167a   :  { %1740 = vmatprep.subr.bf16.mxu1 %v2088_v27 }
0x167d   :  { %1741 = vmatpush1.bf16.msra.mxu1 %v2086_v16 }
0x167e   :  { %1742 = vmatprep.subr.bf16.mxu1 %v2091_v32 }
0x1681   :  { %1743 = vmatpush1.bf16.msra.mxu1 %v2089_v35 }
0x16ef   :  { %v1445_v51 = vpop.xlane.xlu1 %1444 }
0x16f0   :  { %2238 = vtanh.f32 %v1445_v51  ;;  %v2094_v51 = vld [vmem:[#allocation2 + $0xa4] ss:$8 sps:$4 sm:$0xff]  }
0x16f1   :  { %v1448_v60 = vpop.xlane.xlu0 %1447  ;;  %1744 = vmatprep.subr.bf16.mxu1 %v2094_v51 }
0x16f2   :  { %2240 = vtanh.f32 %v1448_v60  ;;  %v2092_v60 = vld [vmem:[#allocation2 + $0xa0] ss:$8 sps:$4 sm:$0xff]  }
0x16f3   :  { %1745 = vmatpush1.bf16.msra.mxu1 %v2092_v60 }
0x16fa   :  { %v2239_v34 = vpop.eup %2238 }
0x16fb   :  { %v1451_v31 = vmul.f32 1.442695, %v2239_v34  ;;  %v2097_v34 = vld [vmem:[#allocation2 + $0xb4] ss:$8 sps:$4 sm:$0xff]  }
0x16fc   :  { %v2241_v44 = vpop.eup %2240  ;;  %1746 = vmatprep.subr.bf16.mxu1 %v2097_v34 }
0x16fd   :  { %2242 = vpow2.f32 %v1451_v31  ;;  %v1453_v28 = vmul.f32 1.442695, %v2241_v44  ;;  %v2095_v31 = vld [vmem:[#allocation2 + $0xb0] ss:$8 sps:$4 sm:$0xff]   ;;  %v2098_v44 = vld [vmem:[%s2949_s7] sm:$0xff]  }
0x16fe   :  { %1747 = vmatpush1.bf16.msra.mxu1 %v2095_v31  ;;  %1878 = vmatpush1.bf16.msra.mxu0 %v2098_v44 }
0x16ff   :  { %2244 = vpow2.f32 %v1453_v28  ;;  %v2099_v28 = vld [vmem:[%s2949_s7 + $0x8] sm:$0xff]   ;;  %1879 = vmatprep.subr.bf16.mxu0 %v2325_v0 }
0x1702   :  { %1880 = vmatpush1.bf16.msra.mxu0 %v2099_v28 }
0x1703   :  { %1881 = vmatprep.subr.bf16.mxu0 %v2325_v0 }
0x1706   :  { %1882 = vmatpush1.bf16.msra.mxu0 %v2100_v55 }
0x1707   :  { %v2243_v38 = vpop.eup %2242  ;;  %1883 = vmatprep.subr.bf16.mxu0 %v2325_v0 }
0x1708   :  { %v1462_v41 = vrot.slane %v2243_v38, %v2837_v36 }
0x1709   :  { %v2245_v39 = vpop.eup %2244 }
0x170a   :  { %v1466_v42 = vrot.slane %v2245_v39, %v2837_v36 }
0x170c   :  { %v1468_v48 = vsel %vm1467_vm10, %v1466_v42, %v1462_v41  ;;  %v2103_v41 = vld [vmem:[%s2949_s7 + $0x28] sm:$0xff]   ;;  %v2104_v42 = vld [vmem:[%s2949_s7 + $0x30] sm:$0xff]  }
0x170d   :  { %v1471_v45 = vsel %vm1470_vm11, %v1468_v48, 0.0  ;;  %v2105_v48 = vld [vmem:[%s2949_s7 + $0x38] sm:$0xff]  }
0x170e   :  { %1472 = vadd.xlane.f32.xlu0 %v1471_v45  ;;  %v2106_v45 = vld [vmem:[%s2949_s7 + $0x40] sm:$0xff]  }
0x179b   :  { %v1473_v10 = vpop.xlane.xlu0 %1472 }
0x179c   :  { %v1478_v37 = vrot.slane %v1473_v10, %v2490_v17  ;;  %v1482_v62 = vrot.slane %v1473_v10, %v2484_v15 }
0x179e   :  { %2246 = vrcp.f32 %v1478_v37 }
0x179f   :  { %2248 = vrcp.f32 %v1482_v62  ;;  %v2107_v62 = vld [vmem:[%s2949_s7 + $0x48] sm:$0xff]  }
0x17a8   :  { %v2247_v18 = vpop.eup %2246 }
0x17a9   :  { %v2249_v20 = vpop.eup %2248  ;;  %v1486_v21 = vmul.f32 %v2247_v18, %v2243_v38  ;;  %v2101_v38 = vld [vmem:[%s2949_s7 + $0x18] sm:$0xff]  }
0x17aa   :  { %v1488_v1 = vmul.f32 %v2249_v20, %v2245_v39  ;;  %1884 = vmatpush1.bf16.msra.mxu0 %v2101_v38  ;;  %v2102_v39 = vld [vmem:[%s2949_s7 + $0x20] sm:$0xff]   ;;  %s1946_s7 = sshll.u32 %s2330_s6, 4  ;;  %s1947_s7 = int_to_ptr.vmem [resolvable:$true] %s1946_s7 }
0x17ab   :  { %v1489_v25 = vadd.f32 1e-10, %v1486_v21  ;;  %1885 = vmatprep.subr.bf16.mxu0 %v2325_v0  ;;  %s2272_s4 = scalar_lea.vmem %s1947_s7, 32  ;;  %p2277_p9 = scmp.lt.s32.totalorder %s1947_s7, %s1947_s7 }
0x17ac   :  { %v1490_v23 = vadd.f32 1e-10, %v1488_v1  ;;  %p2273_p8 = scmp.ne.s32.totalorder %s1947_s7, %s2272_s4  ;;  %p2278_p10 = scmp.lt.s32.totalorder %s2272_s4, %s2272_s4 }
0x17ad   :  { %1493 = vperm.xlu1 %2044, %v1489_v25  }
0x17ae   :  { %1498 = vperm.xlu0 %2045, %v1490_v23   ;;  %1886 = vmatpush1.bf16.msra.mxu0 %v2102_v39  ;;  %p2279_p11 = por %p2278_p10, %p2277_p9 }
0x17af   :  { %1887 = vmatprep.subr.bf16.mxu0 %v2325_v0 }
0x17b0   :  { %p2280_p12 = pnand %p2279_p11, %p2273_p8 }
0x17b1   :  { %1555 = vrot.lane.b32.xlu1 %v1554_v43, %s2327_s3 }
0x17b2   :  { %1888 = vmatpush1.bf16.msra.mxu0 %v2103_v41 }
0x17b3   :  { %1889 = vmatprep.subr.bf16.mxu0 %v2325_v0 }
0x17b6   :  { %1890 = vmatpush1.bf16.msra.mxu0 %v2104_v42 }
0x17b7   :  { %1891 = vmatprep.subr.bf16.mxu0 %v2325_v0 }
0x17ba   :  { %1892 = vmatpush1.bf16.msra.mxu0 %v2105_v48 }
0x17bb   :  { %1893 = vmatprep.subr.bf16.mxu0 %v2325_v0 }
0x17be   :  { %1894 = vmatpush1.bf16.msra.mxu0 %v2106_v45 }
0x17bf   :  { %1895 = vmatprep.subr.bf16.mxu0 %v2325_v0 }
0x17c2   :  { %1896 = vmatpush1.bf16.msra.mxu0 %v2107_v62 }
0x17c3   :  { %1897 = vmatprep.subr.bf16.mxu0 %v2325_v0 }
0x17c6   :  { %1898 = vmatpush1.bf16.msra.mxu0 %v2108_v26 }
0x17c7   :  { %1899 = vmatprep.subr.bf16.mxu0 %v2325_v0 }
0x17ca   :  { %1900 = vmatpush1.bf16.msra.mxu0 %v2109_v63 }
0x182c   :  { %v1494_v46 = vpop.permute.xlu1 %1493 }
0x182d   :  { %v1499_v47 = vpop.permute.xlu0 %1498  ;;  %v1501_v49 = vmul.f32 %v1494_v46, %v2814_v11  ;;  %v1922_v13 = vrot.slane %v1494_v46, %v2837_v36 }
0x182e   :  { %v1502_v14 = vmul.f32 %v1499_v47, %v2822_v5  ;;  %v1926_v52 = vrot.slane %v1499_v47, %v2837_v36 }
0x182f   :  { %v1503_v54 = vsel %vm181_vm2, %v1501_v49, 0.0 }
0x1830   :  { %v1510_v57 = vsel %vm181_vm2, %v1502_v14, 0.0  ;;  %v1504_v59 = vrot.slane %v1503_v54, 4  ;;  %v1927_v56 = vsel %vm1467_vm10, %v1926_v52, %v1922_v13  ;;  %v1556_v9 = vpop.permute.xlu1 %1555 }
0x1831   :  { %v1511_v50 = vrot.slane %v1510_v57, 4  ;;  %1929 = vst.msk [vmem:[#allocation6] sm:$0x3] %vm1470_vm11, %v1927_v56 }
0x1832   :  { %v1505_v3 = vadd.f32 %v1504_v59, %v1503_v54 }
0x1833   :  { %v1512_v53 = vadd.f32 %v1511_v50, %v1510_v57 }
0x1834   :  { %v1506_v40 = vrot.slane %v1505_v3, 2 }
0x1835   :  { %v1513_v11 = vrot.slane %v1512_v53, 2 }
0x1836   :  { %v1507_v4 = vadd.f32 %v1506_v40, %v1505_v3 }
0x1837   :  { %v1514_v7 = vadd.f32 %v1513_v11, %v1512_v53 }
0x1838   :  { %v1508_v24 = vrot.slane %v1507_v4, 1 }
0x1839   :  { %v1515_v5 = vrot.slane %v1514_v7, 1 }
0x183a   :  { %v1509_v22 = vadd.f32 %v1508_v24, %v1507_v4 }
0x183b   :  { %v1516_v36 = vadd.f32 %v1515_v5, %v1514_v7 }
0x183d   :  { %v1550_v2 = vsel %vm1467_vm10, %v1516_v36, %v1509_v22 }
0x183e   :  { %v1562_v10 = vsel %vm181_vm2, %v1550_v2, %v1556_v9 }
0x183f   :  { %v1563_v37 = vpack.c.bf16 %v1562_v10, %v1562_v10 }
0x1841   :  { %1757 = vmatmul.mubr.bf16.vlgmr.msra.gmra.mrb[16].mxu1 %v1563_v37 }
0x1914   :  { %v1758_v12 = vpop.f32.mrb[16].mxu1 }
0x1915   :  { %v1759_v18 = vadd.f32 %v1758_v12, %v1594_v6  ;;  %v1760_v19 = vpop.f32.mrb[17].mxu1 }
0x1916   :  { %v1761_v20 = vadd.f32 %v1760_v19, %v1598_v8  ;;  %v1762_v21 = vpop.f32.mrb[18].mxu1 }
0x1917   :  { %v1765_v1 = vmax.f32 %v1759_v18, 0.0  ;;  %v1763_v0 = vpop.f32.mrb[19].mxu1 }
0x1918   :  { %v1766_v61 = vmax.f32 %v1761_v20, 0.0 }
0x1919   :  { %v1767_v25 = vadd.f32 %v1765_v1, %v1562_v10 }
0x191a   :  { %v1768_v23 = vadd.f32 %v1766_v61, %v2830_v33 }
0x191b   :  { %v1769_v30 = vpack.c.bf16 %v1767_v25, %v1767_v25 }
0x191c   :  { %v1770_v29 = vpack.c.bf16 %v1768_v23, %v1768_v23 }
0x191e   :  { %2033 = vmatprep.mubr.msk.bf16.mxu0 %vm181_vm2, %v1770_v29 }
0x191f   :  { %1910 = vmatmul.mubr.bf16.vlgmr.msra.gmra.mrb[20].mxu0 %v1769_v30 }
0x1920   :  { %2283 = shalt.err (!%p2280_p12)
}
0x1921   :  { %s2284_s11 = scalar_lea.hbm %s2952_s10, 32 }
0x1922   :  { %p2285_p13 = scmp.ne.s32.totalorder %s2952_s10, %s2284_s11  ;;  %p2288_p0 = scmp.lt.u32.totalorder %s2284_s11, %s2952_s10 }
0x1924   :  { %p2290_p1 = pnand %p2288_p0, %p2285_p13 }
0x1926   :  { %2293 = shalt.err (!%p2290_p1)
}
0x1927   :  { %1949 = dma.vmem_to_hbm [thread:$0]  %s1947_s7, 32, %s2952_s10, [#allocation7]   ;;  %v2020_v15 = vld [vmem:[%s2950_s8] ss:$0 sm:$0xff]  ;;  %vm1917_vm12 = vcmask 17408  }
0x1928   :  { %s2331_s20 = smov [#allocation5]  }
0x1929   :  { %s1936_s21 = sshll.u32 %s2331_s20, 4  ;;  %s1937_s21 = int_to_ptr.vmem [resolvable:$true] %s1936_s21 }
0x192a   :  { %s2294_s22 = scalar_lea.vmem %s1937_s21, 32  ;;  %p2299_p3 = scmp.lt.s32.totalorder %s1937_s21, %s1937_s21 }
0x192b   :  { %p2295_p2 = scmp.ne.s32.totalorder %s1937_s21, %s2294_s22  ;;  %p2300_p4 = scmp.lt.s32.totalorder %s2294_s22, %s2294_s22 }
0x192d   :  { %p2301_p5 = por %p2300_p4, %p2299_p3 }
0x192f   :  { %p2302_p6 = pnand %p2301_p5, %p2295_p2 }
0x19f2   :  { %v1911_v17 = vpop.f32.mrb[20].mxu0 }
0x19f3   :  { %v1912_v33 = vadd.f32 %v2020_v15, %v1911_v17  ;;  %v1913_v27 = vpop.f32.mrb[21].mxu0 }
0x19f4   :  { %v1914_v43 = vpop.f32.mrb[22].mxu0 }
0x19f5   :  { %v1915_v16 = vpop.f32.mrb[23].mxu0  ;;  %1918 = vst.msk [vmem:[#allocation5] sm:$0x3] %vm1917_vm12, %v1912_v33 }
0x19f6   :  { %2305 = shalt.err (!%p2302_p6)
}
0x19f7   :  { %s2306_s8 = scalar_lea.hbm %s2951_s9, 32 }
0x19f8   :  { %p2307_p7 = scmp.ne.s32.totalorder %s2951_s9, %s2306_s8  ;;  %p2310_p8 = scmp.lt.u32.totalorder %s2306_s8, %s2951_s9 }
0x19fa   :  { %p2312_p9 = pnand %p2310_p8, %p2307_p7 }
0x19fc   :  { %2315 = shalt.err (!%p2312_p9)
}
0x19fd   :  { %1939 = dma.vmem_to_hbm [thread:$0]  %s1937_s21, 32, %s2951_s9, [#allocation4]  }
0x19fe   :  { %2318 = dma.done.wait [#allocation4], 32  }
0x19ff   :  { %2319 = vsyncadd [#allocation4], 4294967264 }
0x1a00   :  { %2320 = dma.done.wait [#allocation7], 32  }
0x1a01   :  { %2321 = vsyncadd [#allocation7], 4294967264 }
0x1a02   :  { %1956 = vsyncpa [#allocation3], 1 }
0x1a03   :  { %1957 = vsyncpa [#allocation4], 1 }
0x1a04   :  { %1958 = vsyncpa [#allocation7], 1 }

</bundles_post_ra>
